<compile_context>
chip_gen: v7x
topology: tpu7x:2x2x1
jax: 0.10.0
libtpu: 0.0.40
codegen_flags: <defaults>
</compile_context>

<pallas_src>
import numpy as np
import jax
import jax.numpy as jnp
from jax.experimental import pallas as pl
from jax.experimental.pallas import tpu as pltpu

D_EMBED = 512


def _round_up(x, m):
    return (x + m - 1) // m * m


def clip_kernel(img_ref, wimg_ref, bimg_ref,
                txt_ref, wtxt_ref, btxt_ref,
                scale_ref,
                lpi_ref, acc_ref, txtn_ref):
    """Fused CLIP head.

    grid = (n_i, n_k): axis 0 tiles image rows ("parallel"), axis 1 tiles the
    image-projection contraction dimension ("arbitrary", accumulated).

    img_ref   : [tile_i, tk]   bf16  one (row-block, K) slab of flattened images
    wimg_ref  : [tk, 512]      bf16  one K slab of the image projection weight
    bimg_ref  : [1, 512]       f32
    txt_ref   : [Nt_p, 512]    bf16  text-encoder features (resident)
    wtxt_ref  : [512, 512]     bf16  text_fc weight (resident)
    btxt_ref  : [1, 512]       f32
    scale_ref : [1]            f32 SMEM: exp(logit_scale), precomputed host side
    lpi_ref   : [tile_i, Nt_p] f32   logits_per_image block (lane-dense)
    acc_ref   : [tile_i, 512]  f32   VMEM accumulator for the image projection
    txtn_ref  : [512, Nt_p]    bf16  VMEM scratch: normalized text emb, transposed
    """
    k = pl.program_id(1)
    n_k = pl.num_programs(1)

    @pl.when(k == 0)
    def _init():
        acc_ref[...] = jnp.zeros_like(acc_ref)
        # Text path (text_fc -> L2 normalize -> transpose) at the first K step:
        # hides under the image K-slab DMAs of the remaining steps instead of
        # serializing in the epilogue.
        txt_emb = jnp.dot(txt_ref[...], wtxt_ref[...],
                          preferred_element_type=jnp.float32) + btxt_ref[...]
        txt_n = txt_emb * jax.lax.rsqrt(
            jnp.sum(txt_emb * txt_emb, axis=1, keepdims=True) + 1e-12)
        # Stored pre-transposed [D, Nt_p] so the epilogue matmul is canonical
        # [M,K]@[K,N] (no transposed-rhs lowering on the latency-critical tail).
        txtn_ref[...] = txt_n.T.astype(txtn_ref.dtype)

    # Image projection partial product: bf16 MXU, f32 accumulate.
    acc_ref[...] += jnp.dot(img_ref[...], wimg_ref[...],
                            preferred_element_type=jnp.float32)

    @pl.when(k == n_k - 1)
    def _finalize():
        # image embedding = flatten(img) @ W_img + b_img
        img_emb = acc_ref[...] + bimg_ref[...]
        ss = jnp.sum(img_emb * img_emb, axis=1, keepdims=True)
        # L2 normalize with exp(logit_scale) folded into the per-row rsqrt
        # factor: one scalar x [tile_i, 1] multiply instead of a full-width one.
        img_s = img_emb * (scale_ref[0] * jax.lax.rsqrt(ss + 1e-12))
        # logits = (exp(s) * img_n) @ txt_n.T, both operands bf16 (f32 acc):
        # avoids the multi-pass f32xf32 MXU decomposition.
        lpi_ref[...] = jnp.dot(img_s.astype(jnp.bfloat16), txtn_ref[...],
                               preferred_element_type=jnp.float32)


def prepare_clip_head_params(w_img, b_img, w_txt, b_txt, logit_scale, *, tk=2048):
    """One-time (model-load) weight cast/pad; keeps the hot path batch-only."""
    K, D = w_img.shape
    assert D == D_EMBED and w_txt.shape == (D, D)
    # K tile: as large as allowed (fewer grid steps, better DMA efficiency)
    # while still dividing padded K; lane-aligned (multiple of 256).
    tk_eff = min(tk, _round_up(K, 256))
    K_p = _round_up(K, tk_eff)
    bf16, f32 = jnp.bfloat16, jnp.float32
    wimg_p = jnp.zeros((K_p, D), bf16).at[:K, :].set(w_img.astype(bf16))
    return dict(
        K=K, K_p=K_p, tk=tk_eff, D=D,
        wimg=wimg_p,
        bimg=b_img.astype(f32).reshape(1, D),
        wtxt=w_txt.astype(bf16),
        btxt=b_txt.astype(f32).reshape(1, D),
        # exp(logit_scale) precomputed host-side; read from SMEM in-kernel.
        exp_scale=jnp.exp(logit_scale.astype(f32)).reshape(1),
    )


def clip_forward(img_flat, txt_feat, params):
    """Fused CLIP head. Returns (logits_per_image [Ni,Nt], logits_per_text [Nt,Ni])."""
    Ni, K = img_flat.shape
    Nt, D = txt_feat.shape
    assert K == params["K"] and D == params["D"]
    K_p, tk = params["K_p"], params["tk"]
    n_k = K_p // tk

    # Image rows: pad to the bf16 sublane tile; for large batches tile to the
    # MXU height (256) on a leading "parallel" grid axis (uses both v7x TCs).
    if Ni <= 256:
        Ni_p = _round_up(max(Ni, 16), 16)
        tile_i = Ni_p
    else:
        Ni_p = _round_up(Ni, 256)
        tile_i = 256
    n_i = Ni_p // tile_i
    # Text rows -> multiple of 128: lane axis of the logits output, keeping the
    # final store lane-dense / unmasked.
    Nt_p = _round_up(max(Nt, 128), 128)

    f32, bf16 = jnp.float32, jnp.bfloat16
    img_p = jnp.zeros((Ni_p, K_p), bf16).at[:Ni, :K].set(img_flat.astype(bf16))
    txt_p = jnp.zeros((Nt_p, D), bf16).at[:Nt, :].set(txt_feat.astype(bf16))

    # Deeper pipelining on the streamed K slabs when there are enough steps to
    # profit (helps most on v5e's ~820 GB/s HBM); default double-buffer otherwise.
    if n_k >= 3:
        img_spec = pl.BlockSpec((tile_i, tk), lambda i, k: (i, k),
                                pipeline_mode=pl.Buffered(3))
        wimg_spec = pl.BlockSpec((tk, D), lambda i, k: (k, 0),
                                 pipeline_mode=pl.Buffered(3))
        nbuf = 3
    else:
        img_spec = pl.BlockSpec((tile_i, tk), lambda i, k: (i, k))
        wimg_spec = pl.BlockSpec((tk, D), lambda i, k: (k, 0))
        nbuf = 2

    # VMEM budget, re-derived per call so the plan also fits v7x's 64 MiB VMEM.
    vmem_need = (nbuf * (tile_i * tk + tk * D) * 2        # streamed bf16 slabs
                 + 2 * (Nt_p * D + D * D) * 2             # resident bf16 text side
                 + 2 * 2 * D * 4                          # biases
                 + 2 * tile_i * Nt_p * 4                  # logits output
                 + tile_i * D * 4 + D * Nt_p * 2)         # accumulator + txt scratch
    vmem_limit = int(min(max(2 * vmem_need, 16 * 1024 * 1024), 48 * 1024 * 1024))

    flops = (2 * Ni_p * K_p * D            # image projection
             + 2 * n_i * Nt_p * D * D      # text_fc (once per row-block)
             + 2 * Ni_p * Nt_p * D)        # logits
    bytes_accessed = (img_p.size * 2 + params["wimg"].size * 2 + txt_p.size * 2
                      + params["wtxt"].size * 2 + 2 * D * 4 * 2
                      + Ni_p * Nt_p * 4 + 4)

    lpi_pad = pl.pallas_call(
        clip_kernel,
        out_shape=jax.ShapeDtypeStruct((Ni_p, Nt_p), f32),
        grid=(n_i, n_k),
        in_specs=[
            img_spec,                                          # image K-slab
            wimg_spec,                                         # W_img K-slab
            pl.BlockSpec((1, D), lambda i, k: (0, 0)),         # b_img
            pl.BlockSpec((Nt_p, D), lambda i, k: (0, 0)),      # text features
            pl.BlockSpec((D, D), lambda i, k: (0, 0)),         # W_txt
            pl.BlockSpec((1, D), lambda i, k: (0, 0)),         # b_txt
            pl.BlockSpec(memory_space=pltpu.MemorySpace.SMEM), # exp(scale)
        ],
        out_specs=pl.BlockSpec((tile_i, Nt_p), lambda i, k: (i, 0)),
        scratch_shapes=[pltpu.VMEM((tile_i, D), f32),
                        pltpu.VMEM((D, Nt_p), bf16)],
        compiler_params=pltpu.CompilerParams(
            dimension_semantics=("parallel", "arbitrary"),
            vmem_limit_bytes=vmem_limit),
        cost_estimate=pl.CostEstimate(
            flops=flops,
            transcendentals=Ni_p + n_i * Nt_p,
            bytes_accessed=bytes_accessed),
    )(img_p, params["wimg"], params["bimg"], txt_p, params["wtxt"],
      params["btxt"], params["exp_scale"])

    logits_per_image = lpi_pad[:Ni, :Nt]
    # PyTorch reference: logits_per_text = logits_per_image.t()
    logits_per_text = logits_per_image.T
    return logits_per_image, logits_per_text


def make_params(key, in_features, vocab_size):
    ks = jax.random.split(key, 5)
    # stub image-encoder projection (BasicNet tail): in_features -> 512
    w_img = jax.random.normal(ks[0], (in_features, D_EMBED), jnp.float32) * 0.02
    b_img = jax.random.normal(ks[1], (1, D_EMBED), jnp.float32) * 0.02
    # text_fc: nn.Linear(512, 512)
    w_txt = jax.random.normal(ks[2], (D_EMBED, D_EMBED), jnp.float32) * 0.02
    b_txt = jax.random.normal(ks[3], (1, D_EMBED), jnp.float32) * 0.02
    # stub text-encoder token embedding table: vocab -> 512
    embed = jax.random.normal(ks[4], (vocab_size, D_EMBED), jnp.float32) * 0.02
    # logit_scale = log(1/0.07), scalar parameter like the PyTorch module
    logit_scale = jnp.asarray(np.log(1.0 / 0.07), jnp.float32)
    return w_img, b_img, w_txt, b_txt, embed, logit_scale


if __name__ == "__main__":
    # small shapes: batch=2, channels=4, spatial=16x16, seq=8, vocab=32
    N, C, H, W = 2, 4, 16, 16
    NT, SEQ, VOCAB = 2, 8, 32

    key = jax.random.PRNGKey(0)
    k_img, k_txt, k_par = jax.random.split(key, 3)

    # input images in NCHW (PyTorch convention)
    input_images = jax.random.normal(k_img, (N, C, H, W), jnp.float32)
    # input texts as token ids
    input_texts = jax.random.randint(k_txt, (NT, SEQ), 0, VOCAB, jnp.int32)

    in_features = C * H * W
    w_img, b_img, w_txt, b_txt, embed, logit_scale = make_params(
        k_par, in_features, VOCAB)

    # One-time model-load step: weight cast/pad hoisted off the hot path.
    head_params = prepare_clip_head_params(w_img, b_img, w_txt, b_txt, logit_scale)

    # ---- glue (plain JAX) ----
    # image_encoder stub front: flatten NCHW row-major -> [N, C*H*W]
    img_flat = input_images.reshape(N, in_features)
    # text_encoder stub: embedding lookup + mean pool over sequence -> [NT, 512]
    txt_feat = jnp.mean(embed[input_texts], axis=1)

    # ---- fused Pallas kernel: projections, normalization, CLIP logits ----
    logits_per_image, logits_per_text = clip_forward(img_flat, txt_feat, head_params)

    jax.block_until_ready((logits_per_image, logits_per_text))
    assert logits_per_image.shape == (N, NT)
    assert logits_per_text.shape == (NT, N)
    print("KERNEL_OK")
</pallas_src>

<mosaic_0001>
module attributes {stable_mosaic.version = 11 : i64} {
  func.func @clip_kernel(%arg0: i32, %arg1: i32, %arg2: memref<16x1024xbf16, #tpu.memory_space<vmem>>, %arg3: memref<1024x512xbf16, #tpu.memory_space<vmem>>, %arg4: memref<1x512xf32, #tpu.memory_space<vmem>>, %arg5: memref<128x512xbf16, #tpu.memory_space<vmem>>, %arg6: memref<512x512xbf16, #tpu.memory_space<vmem>>, %arg7: memref<1x512xf32, #tpu.memory_space<vmem>>, %arg8: memref<1xf32, #tpu.memory_space<smem>>, %arg9: memref<16x128xf32, #tpu.memory_space<vmem>>, %arg10: memref<16x512xf32, #tpu.memory_space<vmem>>, %arg11: memref<512x128xbf16, #tpu.memory_space<vmem>>) attributes {dimension_semantics = [#tpu.dimension_semantics<parallel>, #tpu.dimension_semantics<arbitrary>], iteration_bounds = array<i64: 1, 1>, scalar_prefetch = 0 : i64, scratch_operands = 2 : i64, tpu.core_type = #tpu.core_type<tc>, window_params = [{transform_indices = @transform_0, window_bounds = array<i64: 16, 1024>}, {transform_indices = @transform_1, window_bounds = array<i64: 1024, 512>}, {pipeline_mode = #tpu.pipeline_mode<synchronous>, transform_indices = @transform_2, window_bounds = array<i64: 1, 512>}, {pipeline_mode = #tpu.pipeline_mode<synchronous>, transform_indices = @transform_3, window_bounds = array<i64: 128, 512>}, {pipeline_mode = #tpu.pipeline_mode<synchronous>, transform_indices = @transform_4, window_bounds = array<i64: 512, 512>}, {pipeline_mode = #tpu.pipeline_mode<synchronous>, transform_indices = @transform_5, window_bounds = array<i64: 1, 512>}, {transform_indices = @transform_6, window_bounds = array<i64: 1>}, {transform_indices = @transform_7, window_bounds = array<i64: 16, 128>}]} {
    %c0_i32 = arith.constant 0 : i32
    %0 = arith.cmpi eq, %arg1, %c0_i32 : i32
    %1 = arith.extui %0 : i1 to i32
    %c0_i32_0 = arith.constant 0 : i32
    %2 = arith.cmpi ne, %1, %c0_i32_0 : i32
    scf.if %2 {
      %cst_10 = arith.constant 0.000000e+00 : f32
      %12 = vector.broadcast %cst_10 : f32 to vector<16x512xf32>
      %c0_11 = arith.constant 0 : index
      %c0_12 = arith.constant 0 : index
      %13 = vector.load %arg10[%c0_11, %c0_12] : memref<16x512xf32, #tpu.memory_space<vmem>>, vector<16x512xf32>
      tpu.vector_store %arg10[%c0_11, %c0_12], %12 {strides = array<i32>} : memref<16x512xf32, #tpu.memory_space<vmem>>, vector<16x512xf32>,
      %c0_13 = arith.constant 0 : index
      %c0_14 = arith.constant 0 : index
      %14 = vector.load %arg5[%c0_13, %c0_14] : memref<128x512xbf16, #tpu.memory_space<vmem>>, vector<128x512xbf16>
      %c0_15 = arith.constant 0 : index
      %c0_16 = arith.constant 0 : index
      %15 = vector.load %arg6[%c0_15, %c0_16] : memref<512x512xbf16, #tpu.memory_space<vmem>>, vector<512x512xbf16>
      %cst_17 = arith.constant dense<0.000000e+00> : vector<128x512xf32>
      %16 = tpu.matmul %14, %15, %cst_17 {dimension_numbers = #tpu.dot_dimension_numbers<[1], [0], [0], [1], [0, 0, 1, 1], [], []>} : vector<128x512xbf16>, vector<512x512xbf16>, vector<128x512xf32> -> vector<128x512xf32>
      %c0_18 = arith.constant 0 : index
      %c0_19 = arith.constant 0 : index
      %17 = vector.load %arg7[%c0_18, %c0_19] : memref<1x512xf32, #tpu.memory_space<vmem>>, vector<1x512xf32>
      %18 = vector.broadcast %17 : vector<1x512xf32> to vector<128x512xf32>
      %19 = arith.addf %16, %18 : vector<128x512xf32>
      %20 = arith.mulf %19, %19 : vector<128x512xf32>
      %cst_20 = arith.constant dense<0.000000e+00> : vector<128xf32>
      %21 = vector.multi_reduction <add>, %20, %cst_20 [1] : vector<128x512xf32> to vector<128xf32>
      %22 = vector.shape_cast %21 : vector<128xf32> to vector<128x1xf32>
      %cst_21 = arith.constant 9.99999996E-13 : f32
      %23 = vector.broadcast %cst_21 : f32 to vector<128x1xf32>
      %24 = arith.addf %22, %23 : vector<128x1xf32>
      %25 = math.rsqrt %24 : vector<128x1xf32>
      %26 = vector.broadcast %25 : vector<128x1xf32> to vector<128x512xf32>
      %27 = arith.mulf %19, %26 : vector<128x512xf32>
      %28 = tpu.transpose %27, [1, 0] : vector<128x512xf32> -> vector<512x128xf32>
      %29 = arith.truncf %28 : vector<512x128xf32> to vector<512x128xbf16>
      %c0_22 = arith.constant 0 : index
      %c0_23 = arith.constant 0 : index
      %30 = vector.load %arg11[%c0_22, %c0_23] : memref<512x128xbf16, #tpu.memory_space<vmem>>, vector<512x128xbf16>
      tpu.vector_store %arg11[%c0_22, %c0_23], %29 {strides = array<i32>} : memref<512x128xbf16, #tpu.memory_space<vmem>>, vector<512x128xbf16>,
    } else {
    }
    %c0 = arith.constant 0 : index
    %c0_1 = arith.constant 0 : index
    %3 = vector.load %arg10[%c0, %c0_1] : memref<16x512xf32, #tpu.memory_space<vmem>>, vector<16x512xf32>
    %c0_2 = arith.constant 0 : index
    %c0_3 = arith.constant 0 : index
    %4 = vector.load %arg2[%c0_2, %c0_3] : memref<16x1024xbf16, #tpu.memory_space<vmem>>, vector<16x1024xbf16>
    %c0_4 = arith.constant 0 : index
    %c0_5 = arith.constant 0 : index
    %5 = vector.load %arg3[%c0_4, %c0_5] : memref<1024x512xbf16, #tpu.memory_space<vmem>>, vector<1024x512xbf16>
    %cst = arith.constant dense<0.000000e+00> : vector<16x512xf32>
    %6 = tpu.matmul %4, %5, %cst {dimension_numbers = #tpu.dot_dimension_numbers<[1], [0], [0], [1], [0, 0, 1, 1], [], []>} : vector<16x1024xbf16>, vector<1024x512xbf16>, vector<16x512xf32> -> vector<16x512xf32>
    %7 = arith.addf %3, %6 : vector<16x512xf32>
    %c0_6 = arith.constant 0 : index
    %c0_7 = arith.constant 0 : index
    %8 = vector.load %arg10[%c0_6, %c0_7] : memref<16x512xf32, #tpu.memory_space<vmem>>, vector<16x512xf32>
    tpu.vector_store %arg10[%c0_6, %c0_7], %7 {strides = array<i32>} : memref<16x512xf32, #tpu.memory_space<vmem>>, vector<16x512xf32>,
    %c0_i32_8 = arith.constant 0 : i32
    %9 = arith.cmpi eq, %arg1, %c0_i32_8 : i32
    %10 = arith.extui %9 : i1 to i32
    %c0_i32_9 = arith.constant 0 : i32
    %11 = arith.cmpi ne, %10, %c0_i32_9 : i32
    scf.if %11 {
      %c0_10 = arith.constant 0 : index
      %c0_11 = arith.constant 0 : index
      %12 = vector.load %arg10[%c0_10, %c0_11] : memref<16x512xf32, #tpu.memory_space<vmem>>, vector<16x512xf32>
      %c0_12 = arith.constant 0 : index
      %c0_13 = arith.constant 0 : index
      %13 = vector.load %arg4[%c0_12, %c0_13] : memref<1x512xf32, #tpu.memory_space<vmem>>, vector<1x512xf32>
      %14 = vector.broadcast %13 : vector<1x512xf32> to vector<16x512xf32>
      %15 = arith.addf %12, %14 : vector<16x512xf32>
      %16 = arith.mulf %15, %15 : vector<16x512xf32>
      %cst_14 = arith.constant dense<0.000000e+00> : vector<16xf32>
      %17 = vector.multi_reduction <add>, %16, %cst_14 [1] : vector<16x512xf32> to vector<16xf32>
      %18 = vector.shape_cast %17 : vector<16xf32> to vector<16x1xf32>
      %c0_15 = arith.constant 0 : index
      %19 = memref.load %arg8[%c0_15] : memref<1xf32, #tpu.memory_space<smem>>
      %cst_16 = arith.constant 9.99999996E-13 : f32
      %20 = vector.broadcast %cst_16 : f32 to vector<16x1xf32>
      %21 = arith.addf %18, %20 : vector<16x1xf32>
      %22 = math.rsqrt %21 : vector<16x1xf32>
      %23 = vector.broadcast %19 : f32 to vector<16x1xf32>
      %24 = arith.mulf %23, %22 : vector<16x1xf32>
      %25 = vector.broadcast %24 : vector<16x1xf32> to vector<16x512xf32>
      %26 = arith.mulf %15, %25 : vector<16x512xf32>
      %27 = arith.truncf %26 : vector<16x512xf32> to vector<16x512xbf16>
      %c0_17 = arith.constant 0 : index
      %c0_18 = arith.constant 0 : index
      %28 = vector.load %arg11[%c0_17, %c0_18] : memref<512x128xbf16, #tpu.memory_space<vmem>>, vector<512x128xbf16>
      %cst_19 = arith.constant dense<0.000000e+00> : vector<16x128xf32>
      %29 = tpu.matmul %27, %28, %cst_19 {dimension_numbers = #tpu.dot_dimension_numbers<[1], [0], [0], [1], [0, 0, 1, 1], [], []>} : vector<16x512xbf16>, vector<512x128xbf16>, vector<16x128xf32> -> vector<16x128xf32>
      %c0_20 = arith.constant 0 : index
      %c0_21 = arith.constant 0 : index
      %30 = vector.load %arg9[%c0_20, %c0_21] : memref<16x128xf32, #tpu.memory_space<vmem>>, vector<16x128xf32>
      tpu.vector_store %arg9[%c0_20, %c0_21], %29 {strides = array<i32>} : memref<16x128xf32, #tpu.memory_space<vmem>>, vector<16x128xf32>,
    } else {
    }
    return
  }
  func.func @transform_0(%arg0: i32, %arg1: i32) -> (i32, i32) {
    %c0_i32 = arith.constant 0 : i32
    return %arg0, %arg1 : i32, i32
  }
  func.func @transform_1(%arg0: i32, %arg1: i32) -> (i32, i32) {
    %c0_i32 = arith.constant 0 : i32
    %c0_i32_0 = arith.constant 0 : i32
    return %arg1, %c0_i32 : i32, i32
  }
  func.func @transform_2(%arg0: i32, %arg1: i32) -> (i32, i32) {
    %c0_i32 = arith.constant 0 : i32
    %c0_i32_0 = arith.constant 0 : i32
    %c0_i32_1 = arith.constant 0 : i32
    return %c0_i32, %c0_i32_0 : i32, i32
  }
  func.func @transform_3(%arg0: i32, %arg1: i32) -> (i32, i32) {
    %c0_i32 = arith.constant 0 : i32
    %c0_i32_0 = arith.constant 0 : i32
    %c0_i32_1 = arith.constant 0 : i32
    return %c0_i32, %c0_i32_0 : i32, i32
  }
  func.func @transform_4(%arg0: i32, %arg1: i32) -> (i32, i32) {
    %c0_i32 = arith.constant 0 : i32
    %c0_i32_0 = arith.constant 0 : i32
    %c0_i32_1 = arith.constant 0 : i32
    return %c0_i32, %c0_i32_0 : i32, i32
  }
  func.func @transform_5(%arg0: i32, %arg1: i32) -> (i32, i32) {
    %c0_i32 = arith.constant 0 : i32
    %c0_i32_0 = arith.constant 0 : i32
    %c0_i32_1 = arith.constant 0 : i32
    return %c0_i32, %c0_i32_0 : i32, i32
  }
  func.func @transform_6(%arg0: i32, %arg1: i32) -> i32 {
    %c0_i32 = arith.constant 0 : i32
    %c0_i32_0 = arith.constant 0 : i32
    return %c0_i32 : i32
  }
  func.func @transform_7(%arg0: i32, %arg1: i32) -> (i32, i32) {
    %c0_i32 = arith.constant 0 : i32
    %c0_i32_0 = arith.constant 0 : i32
    return %arg0, %c0_i32 : i32, i32
  }
}

</mosaic_0001>

<bundles_post_ra>
// kernel: tpu_custom_call.1
= control target key start
LH: loop header
LB: loop body
LE: loop exit
PB: predicated region body
PF: predicated region fallthrough
CT: control target
= control target key end

     0   :  { %13 = vsyncpa [#allocation6], 0  ;;  %s6393_s0 = inlined_call_operand.hbm [shape: bf16[16,1024], index: 0, kind: input, shape index: {}]   ;;  %s6394_s1 = inlined_call_operand.hbm [shape: bf16[1024,512], index: 1, kind: input, shape index: {}]   ;;  %s6395_s2 = inlined_call_operand.vmem [shape: f32[1,512], index: 2, kind: input, shape index: {}]   ;;  %s6396_s3 = inlined_call_operand.hbm [shape: bf16[128,512], index: 3, kind: input, shape index: {}]   ;;  %s6397_s4 = inlined_call_operand.hbm [shape: bf16[512,512], index: 4, kind: input, shape index: {}]   ;;  %s6398_s5 = inlined_call_operand.vmem [shape: f32[1,512], index: 5, kind: input, shape index: {}]   ;;  %s6399_s6 = inlined_call_operand.<no memory space> [shape: f32[1], index: 6, kind: input, shape index: {}]   ;;  %s6400_s7 = inlined_call_operand.hbm [shape: f32[16,128], index: 7, kind: output, shape index: {}]  }
   0x1   :  { %14 = vsyncpa [#allocation9], 0 }
   0x2   :  { %15 = vsyncpa [#allocation12], 0 }
   0x3   :  { %16 = vsyncpa [#allocation7], 0  ;;  %s5761_s24 = smov [#allocation8]   ;;  %s5643_s28 = scalar_lea.hbm %s6394_s1, 32768 }
   0x4   :  { %s34_s25 = sshll.u32 %s5761_s24, 4  ;;  %p5644_p0 = scmp.ne.s32.totalorder %s6394_s1, %s5643_s28  ;;  %s35_s25 = int_to_ptr.vmem [resolvable:$true] %s34_s25 }
   0x5   :  { %p5647_p1 = scmp.lt.u32.totalorder %s5643_s28, %s6394_s1 }
   0x7   :  { %p5649_p2 = pnand %p5647_p1, %p5644_p0 }
   0x9   :  { %5652 = shalt.err (!%p5649_p2)
}
   0xa   :  { %s5653_s10 = scalar_lea.vmem %s35_s25, 32768  ;;  %p5658_p4 = scmp.lt.s32.totalorder %s35_s25, %s35_s25 }
   0xb   :  { %p5654_p3 = scmp.ne.s32.totalorder %s35_s25, %s5653_s10  ;;  %p5659_p5 = scmp.lt.s32.totalorder %s5653_s10, %s5653_s10 }
   0xd   :  { %p5660_p6 = por %p5659_p5, %p5658_p4 }
   0xf   :  { %p5661_p7 = pnand %p5660_p6, %p5654_p3 }
  0x11   :  { %5664 = shalt.err (!%p5661_p7)
}
  0x12   :  { %s5762_s11 = smov 256   ;;  %s5763_s12 = smov 16  }
  0x13   :  { %40 = dma.hbm_to_vmem [thread:$0]  %s6394_s1, 32768, %s35_s25, [#allocation9], %s5762_s11, %s5762_s11, %s5763_s12  }
  0x14   :  { %s5764_s15 = smov [#allocation5]   ;;  %s5665_s19 = scalar_lea.hbm %s6393_s0, 1024 }
  0x15   :  { %s22_s16 = sshll.u32 %s5764_s15, 4  ;;  %p5666_p8 = scmp.ne.s32.totalorder %s6393_s0, %s5665_s19  ;;  %s23_s16 = int_to_ptr.vmem [resolvable:$true] %s22_s16 }
  0x16   :  { %p5669_p9 = scmp.lt.u32.totalorder %s5665_s19, %s6393_s0 }
  0x18   :  { %p5671_p10 = pnand %p5669_p9, %p5666_p8 }
  0x1a   :  { %5674 = shalt.err (!%p5671_p10)
}
  0x1b   :  { %s5675_s24 = scalar_lea.vmem %s23_s16, 1024  ;;  %p5680_p12 = scmp.lt.s32.totalorder %s23_s16, %s23_s16 }
  0x1c   :  { %p5676_p11 = scmp.ne.s32.totalorder %s23_s16, %s5675_s24  ;;  %p5681_p13 = scmp.lt.s32.totalorder %s5675_s24, %s5675_s24 }
  0x1e   :  { %p5682_p0 = por %p5681_p13, %p5680_p12 }
  0x20   :  { %p5683_p1 = pnand %p5682_p0, %p5676_p11 }
  0x22   :  { %5686 = shalt.err (!%p5683_p1)
}
  0x23   :  { %s5765_s1 = smov 512   ;;  %s5766_s25 = smov 32  }
  0x24   :  { %28 = dma.hbm_to_vmem [thread:$0]  %s6393_s0, 1024, %s23_s16, [#allocation6], %s5765_s1, %s5765_s1, %s5766_s25  }
  0x25   :  { %s5767_s28 = smov [#allocation10]   ;;  %s5768_s30 = smov [#allocation11]  }
  0x26   :  { %s48_s29 = sshll.u32 %s5767_s28, 4  ;;  %s60_s8 = sshll.u32 %s5768_s30, 4  ;;  %s49_s29 = int_to_ptr.vmem [resolvable:$true] %s48_s29  ;;  %s5839_s8 = int_to_ptr.vmem [resolvable:$true] %s60_s8 }
  0x27   :  { %s5687_s13 = scalar_lea.hbm %s6396_s3, 4096 }
  0x28   :  { %p5688_p2 = scmp.ne.s32.totalorder %s6396_s3, %s5687_s13  ;;  %p5691_p3 = scmp.lt.u32.totalorder %s5687_s13, %s6396_s3 }
  0x2a   :  { %p5693_p4 = pnand %p5691_p3, %p5688_p2 }
  0x2c   :  { %5696 = shalt.err (!%p5693_p4)
}
  0x2d   :  { %s5697_s0 = scalar_lea.vmem %s49_s29, 4096  ;;  %p5702_p6 = scmp.lt.s32.totalorder %s49_s29, %s49_s29 }
  0x2e   :  { %p5698_p5 = scmp.ne.s32.totalorder %s49_s29, %s5697_s0  ;;  %p5703_p7 = scmp.lt.s32.totalorder %s5697_s0, %s5697_s0 }
  0x30   :  { %p5704_p8 = por %p5703_p7, %p5702_p6 }
  0x32   :  { %p5705_p9 = pnand %p5704_p8, %p5698_p5 }
  0x34   :  { %5708 = shalt.err (!%p5705_p9)
}
  0x35   :  { %54 = dma.hbm_to_vmem [thread:$0]  %s6396_s3, 4096, %s49_s29, [#allocation9], %s5762_s11, %s5762_s11, %s5763_s12  }
  0x36   :  { %s5709_s22 = scalar_lea.hbm %s6397_s4, 16384 }
  0x37   :  { %p5710_p10 = scmp.ne.s32.totalorder %s6397_s4, %s5709_s22  ;;  %p5713_p11 = scmp.lt.u32.totalorder %s5709_s22, %s6397_s4 }
  0x39   :  { %p5715_p12 = pnand %p5713_p11, %p5710_p10 }
  0x3b   :  { %5718 = shalt.err (!%p5715_p12)
}
  0x3c   :  { %s5719_s26 = scalar_lea.vmem %s5839_s8, 16384  ;;  %p5724_p0 = scmp.lt.s32.totalorder %s5839_s8, %s5839_s8 }
  0x3d   :  { %p5720_p13 = scmp.ne.s32.totalorder %s5839_s8, %s5719_s26  ;;  %p5725_p1 = scmp.lt.s32.totalorder %s5719_s26, %s5719_s26 }
  0x3f   :  { %p5726_p2 = por %p5725_p1, %p5724_p0 }
  0x41   :  { %p5727_p3 = pnand %p5726_p2, %p5720_p13 }
  0x43   :  { %5730 = shalt.err (!%p5727_p3)
}
  0x44   :  { %66 = dma.hbm_to_vmem [thread:$0]  %s6397_s4, 16384, %s5839_s8, [#allocation12], %s5762_s11, %s5762_s11, %s5763_s12  }
  0x45   :  { %5753 = dma.done.wait [#allocation6], 1024  }
  0x46   :  { %5754 = vsyncadd [#allocation6], 4294966272 }
  0x47   :  { %5755 = dma.done.wait [#allocation9], 36864  }
  0x48   :  { %5756 = vsyncadd [#allocation9], 4294930432 }
  0x49   :  { %5757 = dma.done.wait [#allocation12], 16384  }
  0x4a   :  { %5758 = vsyncadd [#allocation12], 4294950912  ;;  %v4983_v0 = vld [vmem:[#allocation11 + $0x4] ss:$16 sps:$4 sm:$0xff]   ;;  %v4985_v1 = vld [vmem:[#allocation11 + $0xc] ss:$16 sps:$4 sm:$0xff]  }
  0x4b   :  { %1078 = vmatprep.subr.bf16.mxu0 %v4983_v0  ;;  %v4987_v2 = vld [vmem:[#allocation11] ss:$16 sps:$4 sm:$0xff]   ;;  %v4988_v3 = vld [vmem:[#allocation11 + $0x8] ss:$16 sps:$4 sm:$0xff]   ;;  %1304 = vmatprep.subr.bf16.mxu1 %v4985_v1  ;;  %v4989_v4 = vld [vmem:[#allocation11 + $0x24] ss:$16 sps:$4 sm:$0xff]  }
  0x4c   :  { %1079 = vmatpush1.bf16.msra.mxu0 %v4987_v2  ;;  %1305 = vmatpush1.bf16.msra.mxu1 %v4988_v3  ;;  %v4991_v5 = vld [vmem:[#allocation11 + $0x2c] ss:$16 sps:$4 sm:$0xff]   ;;  %v4993_v6 = vld [vmem:[#allocation11 + $0x20] ss:$16 sps:$4 sm:$0xff]   ;;  %v4994_v7 = vld [vmem:[#allocation11 + $0x28] ss:$16 sps:$4 sm:$0xff]  }
  0x4d   :  { %1080 = vmatprep.subr.bf16.mxu0 %v4989_v4  ;;  %1306 = vmatprep.subr.bf16.mxu1 %v4991_v5  ;;  %v4995_v8 = vld [vmem:[#allocation11 + $0x44] ss:$16 sps:$4 sm:$0xff]   ;;  %v4997_v9 = vld [vmem:[#allocation11 + $0x4c] ss:$16 sps:$4 sm:$0xff]   ;;  %v4999_v10 = vld [vmem:[#allocation11 + $0x40] ss:$16 sps:$4 sm:$0xff]  }
  0x4e   :  { %v5000_v11 = vld [vmem:[#allocation11 + $0x48] ss:$16 sps:$4 sm:$0xff]   ;;  %v5001_v12 = vld [vmem:[#allocation11 + $0x64] ss:$16 sps:$4 sm:$0xff]   ;;  %v5003_v13 = vld [vmem:[#allocation11 + $0x6c] ss:$16 sps:$4 sm:$0xff]  }
  0x4f   :  { %v5005_v14 = vld [vmem:[#allocation11 + $0x60] ss:$16 sps:$4 sm:$0xff]   ;;  %v5006_v15 = vld [vmem:[#allocation11 + $0x68] ss:$16 sps:$4 sm:$0xff]   ;;  %v5007_v16 = vld [vmem:[#allocation11 + $0x84] ss:$16 sps:$4 sm:$0xff]  }
  0x50   :  { %1081 = vmatpush1.bf16.msra.mxu0 %v4993_v6  ;;  %1307 = vmatpush1.bf16.msra.mxu1 %v4994_v7  ;;  %v5009_v17 = vld [vmem:[#allocation11 + $0x8c] ss:$16 sps:$4 sm:$0xff]   ;;  %v5011_v18 = vld [vmem:[#allocation11 + $0x80] ss:$16 sps:$4 sm:$0xff]   ;;  %v5012_v19 = vld [vmem:[#allocation11 + $0x88] ss:$16 sps:$4 sm:$0xff]  }
  0x51   :  { %1082 = vmatprep.subr.bf16.mxu0 %v4995_v8  ;;  %1308 = vmatprep.subr.bf16.mxu1 %v4997_v9  ;;  %v5013_v20 = vld [vmem:[#allocation11 + $0xa4] ss:$16 sps:$4 sm:$0xff]   ;;  %v5015_v21 = vld [vmem:[#allocation11 + $0xac] ss:$16 sps:$4 sm:$0xff]   ;;  %v5017_v22 = vld [vmem:[#allocation11 + $0xa0] ss:$16 sps:$4 sm:$0xff]  }
  0x52   :  { %v5018_v23 = vld [vmem:[#allocation11 + $0xa8] ss:$16 sps:$4 sm:$0xff]   ;;  %v5019_v24 = vld [vmem:[#allocation11 + $0xc4] ss:$16 sps:$4 sm:$0xff]   ;;  %v5021_v25 = vld [vmem:[#allocation11 + $0xcc] ss:$16 sps:$4 sm:$0xff]  }
  0x53   :  { %v5023_v26 = vld [vmem:[#allocation11 + $0xc0] ss:$16 sps:$4 sm:$0xff]   ;;  %v5024_v27 = vld [vmem:[#allocation11 + $0xc8] ss:$16 sps:$4 sm:$0xff]   ;;  %v5025_v28 = vld [vmem:[#allocation11 + $0xe4] ss:$16 sps:$4 sm:$0xff]  }
  0x54   :  { %1083 = vmatpush1.bf16.msra.mxu0 %v4999_v10  ;;  %1309 = vmatpush1.bf16.msra.mxu1 %v5000_v11  ;;  %v5027_v29 = vld [vmem:[#allocation11 + $0xec] ss:$16 sps:$4 sm:$0xff]   ;;  %v5029_v30 = vld [vmem:[#allocation11 + $0xe0] ss:$16 sps:$4 sm:$0xff]   ;;  %v5030_v31 = vld [vmem:[#allocation11 + $0xe8] ss:$16 sps:$4 sm:$0xff]  }
  0x55   :  { %1084 = vmatprep.subr.bf16.mxu0 %v5001_v12  ;;  %1310 = vmatprep.subr.bf16.mxu1 %v5003_v13  ;;  %v5031_v32 = vld [vmem:[#allocation11 + $0x104] ss:$16 sps:$4 sm:$0xff]   ;;  %v5033_v33 = vld [vmem:[#allocation11 + $0x10c] ss:$16 sps:$4 sm:$0xff]   ;;  %v5035_v34 = vld [vmem:[#allocation11 + $0x100] ss:$16 sps:$4 sm:$0xff]  }
  0x56   :  { %v5036_v35 = vld [vmem:[#allocation11 + $0x108] ss:$16 sps:$4 sm:$0xff]   ;;  %v5037_v36 = vld [vmem:[#allocation11 + $0x124] ss:$16 sps:$4 sm:$0xff]   ;;  %v5039_v37 = vld [vmem:[#allocation11 + $0x12c] ss:$16 sps:$4 sm:$0xff]  }
  0x57   :  { %v5041_v38 = vld [vmem:[#allocation11 + $0x120] ss:$16 sps:$4 sm:$0xff]   ;;  %v5042_v39 = vld [vmem:[#allocation11 + $0x128] ss:$16 sps:$4 sm:$0xff]   ;;  %v5043_v40 = vld [vmem:[#allocation11 + $0x144] ss:$16 sps:$4 sm:$0xff]  }
  0x58   :  { %1085 = vmatpush1.bf16.msra.mxu0 %v5005_v14  ;;  %1311 = vmatpush1.bf16.msra.mxu1 %v5006_v15  ;;  %v5045_v41 = vld [vmem:[#allocation11 + $0x14c] ss:$16 sps:$4 sm:$0xff]   ;;  %v5047_v42 = vld [vmem:[#allocation11 + $0x140] ss:$16 sps:$4 sm:$0xff]   ;;  %v5048_v43 = vld [vmem:[#allocation11 + $0x148] ss:$16 sps:$4 sm:$0xff]  }
  0x59   :  { %1086 = vmatprep.subr.bf16.mxu0 %v5007_v16  ;;  %1312 = vmatprep.subr.bf16.mxu1 %v5009_v17  ;;  %v5049_v44 = vld [vmem:[#allocation11 + $0x164] ss:$16 sps:$4 sm:$0xff]   ;;  %v5051_v45 = vld [vmem:[#allocation11 + $0x16c] ss:$16 sps:$4 sm:$0xff]   ;;  %v5053_v46 = vld [vmem:[#allocation11 + $0x160] ss:$16 sps:$4 sm:$0xff]  }
  0x5a   :  { %v5054_v47 = vld [vmem:[#allocation11 + $0x168] ss:$16 sps:$4 sm:$0xff]   ;;  %v5081_v48 = vld [vmem:[#allocation10 + $0x4] ss:$16 sps:$4 sm:$0xff]   ;;  %v5057_v50 = vld [vmem:[#allocation11 + $0x18c] ss:$16 sps:$4 sm:$0xff]  }
  0x5b   :  { %v5055_v49 = vld [vmem:[#allocation11 + $0x184] ss:$16 sps:$4 sm:$0xff]   ;;  %1110 = vmatprep.mubr.bf16.mxu0 %v5081_v48  ;;  %1336 = vmatprep.mubr.bf16.mxu1 %v5081_v48  ;;  %v5059_v51 = vld [vmem:[#allocation11 + $0x180] ss:$16 sps:$4 sm:$0xff]   ;;  %v5060_v52 = vld [vmem:[#allocation11 + $0x188] ss:$16 sps:$4 sm:$0xff]  }
  0x5c   :  { %1087 = vmatpush1.bf16.msra.mxu0 %v5011_v18  ;;  %1313 = vmatpush1.bf16.msra.mxu1 %v5012_v19  ;;  %v5061_v53 = vld [vmem:[#allocation11 + $0x1a4] ss:$16 sps:$4 sm:$0xff]   ;;  %v5063_v54 = vld [vmem:[#allocation11 + $0x1ac] ss:$16 sps:$4 sm:$0xff]   ;;  %v5065_v55 = vld [vmem:[#allocation11 + $0x1a0] ss:$16 sps:$4 sm:$0xff]  }
  0x5d   :  { %1088 = vmatprep.subr.bf16.mxu0 %v5013_v20  ;;  %1314 = vmatprep.subr.bf16.mxu1 %v5015_v21  ;;  %v5066_v56 = vld [vmem:[#allocation11 + $0x1a8] ss:$16 sps:$4 sm:$0xff]   ;;  %v5067_v57 = vld [vmem:[#allocation11 + $0x1c4] ss:$16 sps:$4 sm:$0xff]   ;;  %v5069_v58 = vld [vmem:[#allocation11 + $0x1cc] ss:$16 sps:$4 sm:$0xff]  }
  0x5e   :  { %v5071_v59 = vld [vmem:[#allocation11 + $0x1c0] ss:$16 sps:$4 sm:$0xff]   ;;  %v5072_v60 = vld [vmem:[#allocation11 + $0x1c8] ss:$16 sps:$4 sm:$0xff]   ;;  %v5073_v61 = vld [vmem:[#allocation11 + $0x1e4] ss:$16 sps:$4 sm:$0xff]  }
  0x5f   :  { %v5075_v62 = vld [vmem:[#allocation11 + $0x1ec] ss:$16 sps:$4 sm:$0xff]   ;;  %v5077_v63 = vld [vmem:[#allocation11 + $0x1e0] ss:$16 sps:$4 sm:$0xff]   ;;  %v5078_v0 = vld [vmem:[#allocation11 + $0x1e8] ss:$16 sps:$4 sm:$0xff]  }
  0x60   :  { %1089 = vmatpush1.bf16.msra.mxu0 %v5017_v22  ;;  %1315 = vmatpush1.bf16.msra.mxu1 %v5018_v23  ;;  %v5084_v1 = vld [vmem:[#allocation11 + $0x204] ss:$16 sps:$4 sm:$0xff]   ;;  %v5087_v2 = vld [vmem:[#allocation11 + $0x20c] ss:$16 sps:$4 sm:$0xff]   ;;  %v5079_v3 = vld [vmem:[#allocation10] ss:$16 sps:$4 sm:$0xff]  }
  0x61   :  { %1090 = vmatprep.subr.bf16.mxu0 %v5019_v24  ;;  %1316 = vmatprep.subr.bf16.mxu1 %v5021_v25  ;;  %v5082_v4 = vld [vmem:[#allocation11 + $0x200] ss:$16 sps:$4 sm:$0xff]   ;;  %v5085_v5 = vld [vmem:[#allocation11 + $0x208] ss:$16 sps:$4 sm:$0xff]   ;;  %v5090_v6 = vld [vmem:[#allocation11 + $0x224] ss:$16 sps:$4 sm:$0xff]  }
  0x62   :  { %v5093_v7 = vld [vmem:[#allocation11 + $0x22c] ss:$16 sps:$4 sm:$0xff]   ;;  %v5094_v8 = vld [vmem:[#allocation10 + $0x24] ss:$16 sps:$4 sm:$0xff]   ;;  %v5088_v9 = vld [vmem:[#allocation11 + $0x220] ss:$16 sps:$4 sm:$0xff]  }
  0x63   :  { %v5091_v10 = vld [vmem:[#allocation11 + $0x228] ss:$16 sps:$4 sm:$0xff]   ;;  %v5099_v11 = vld [vmem:[#allocation11 + $0x244] ss:$16 sps:$4 sm:$0xff]   ;;  %v5102_v12 = vld [vmem:[#allocation11 + $0x24c] ss:$16 sps:$4 sm:$0xff]  }
  0x64   :  { %1091 = vmatpush1.bf16.msra.mxu0 %v5023_v26  ;;  %1317 = vmatpush1.bf16.msra.mxu1 %v5024_v27  ;;  %v5096_v13 = vld [vmem:[#allocation10 + $0x20] ss:$16 sps:$4 sm:$0xff]   ;;  %v5100_v15 = vld [vmem:[#allocation11 + $0x248] ss:$16 sps:$4 sm:$0xff]   ;;  %v5105_v16 = vld [vmem:[#allocation11 + $0x264] ss:$16 sps:$4 sm:$0xff]  }
  0x65   :  { %1092 = vmatprep.subr.bf16.mxu0 %v5025_v28  ;;  %1318 = vmatprep.subr.bf16.mxu1 %v5027_v29  ;;  %v5097_v14 = vld [vmem:[#allocation11 + $0x240] ss:$16 sps:$4 sm:$0xff]   ;;  %v5108_v17 = vld [vmem:[#allocation11 + $0x26c] ss:$16 sps:$4 sm:$0xff]   ;;  %v5109_v18 = vld [vmem:[#allocation10 + $0x44] ss:$16 sps:$4 sm:$0xff]  }
  0x66   :  { %v5103_v19 = vld [vmem:[#allocation11 + $0x260] ss:$16 sps:$4 sm:$0xff]   ;;  %v5106_v20 = vld [vmem:[#allocation11 + $0x268] ss:$16 sps:$4 sm:$0xff]   ;;  %v5114_v21 = vld [vmem:[#allocation11 + $0x284] ss:$16 sps:$4 sm:$0xff]  }
  0x67   :  { %v5117_v22 = vld [vmem:[#allocation11 + $0x28c] ss:$16 sps:$4 sm:$0xff]   ;;  %v5111_v23 = vld [vmem:[#allocation10 + $0x40] ss:$16 sps:$4 sm:$0xff]   ;;  %v5115_v25 = vld [vmem:[#allocation11 + $0x288] ss:$16 sps:$4 sm:$0xff]  }
  0x68   :  { %1093 = vmatpush1.bf16.msra.mxu0 %v5029_v30  ;;  %1319 = vmatpush1.bf16.msra.mxu1 %v5030_v31  ;;  %v5112_v24 = vld [vmem:[#allocation11 + $0x280] ss:$16 sps:$4 sm:$0xff]   ;;  %v5120_v26 = vld [vmem:[#allocation11 + $0x2a4] ss:$16 sps:$4 sm:$0xff]   ;;  %v5123_v27 = vld [vmem:[#allocation11 + $0x2ac] ss:$16 sps:$4 sm:$0xff]  }
  0x69   :  { %1094 = vmatprep.subr.bf16.mxu0 %v5031_v32  ;;  %1320 = vmatprep.subr.bf16.mxu1 %v5033_v33  ;;  %v5124_v28 = vld [vmem:[#allocation10 + $0x64] ss:$16 sps:$4 sm:$0xff]   ;;  %v5118_v29 = vld [vmem:[#allocation11 + $0x2a0] ss:$16 sps:$4 sm:$0xff]   ;;  %v5121_v30 = vld [vmem:[#allocation11 + $0x2a8] ss:$16 sps:$4 sm:$0xff]  }
  0x6a   :  { %v5129_v31 = vld [vmem:[#allocation11 + $0x2c4] ss:$16 sps:$4 sm:$0xff]   ;;  %v5132_v32 = vld [vmem:[#allocation11 + $0x2cc] ss:$16 sps:$4 sm:$0xff]   ;;  %v5126_v33 = vld [vmem:[#allocation10 + $0x60] ss:$16 sps:$4 sm:$0xff]  }
  0x6b   :  { %v5154_v48 = vld [vmem:[#allocation10 + $0xa4] ss:$16 sps:$4 sm:$0xff]  }
  0x6c   :  { %1095 = vmatpush1.bf16.msra.mxu0 %v5035_v34  ;;  %1321 = vmatpush1.bf16.msra.mxu1 %v5036_v35  ;;  %v5127_v34 = vld [vmem:[#allocation11 + $0x2c0] ss:$16 sps:$4 sm:$0xff]   ;;  %v5130_v35 = vld [vmem:[#allocation11 + $0x2c8] ss:$16 sps:$4 sm:$0xff]  }
  0x6d   :  { %1096 = vmatprep.subr.bf16.mxu0 %v5037_v36  ;;  %1322 = vmatprep.subr.bf16.mxu1 %v5039_v37  ;;  %v5135_v36 = vld [vmem:[#allocation11 + $0x2e4] ss:$16 sps:$4 sm:$0xff]   ;;  %v5138_v37 = vld [vmem:[#allocation11 + $0x2ec] ss:$16 sps:$4 sm:$0xff]  }
  0x70   :  { %1097 = vmatpush1.bf16.msra.mxu0 %v5041_v38  ;;  %1323 = vmatpush1.bf16.msra.mxu1 %v5042_v39  ;;  %v5139_v38 = vld [vmem:[#allocation10 + $0x84] ss:$16 sps:$4 sm:$0xff]   ;;  %v5133_v39 = vld [vmem:[#allocation11 + $0x2e0] ss:$16 sps:$4 sm:$0xff]  }
  0x71   :  { %1098 = vmatprep.subr.bf16.mxu0 %v5043_v40  ;;  %1324 = vmatprep.subr.bf16.mxu1 %v5045_v41  ;;  %v5136_v40 = vld [vmem:[#allocation11 + $0x2e8] ss:$16 sps:$4 sm:$0xff]   ;;  %v5144_v41 = vld [vmem:[#allocation11 + $0x304] ss:$16 sps:$4 sm:$0xff]  }
  0x74   :  { %1099 = vmatpush1.bf16.msra.mxu0 %v5047_v42  ;;  %1325 = vmatpush1.bf16.msra.mxu1 %v5048_v43  ;;  %v5147_v42 = vld [vmem:[#allocation11 + $0x30c] ss:$16 sps:$4 sm:$0xff]   ;;  %v5141_v43 = vld [vmem:[#allocation10 + $0x80] ss:$16 sps:$4 sm:$0xff]  }
  0x75   :  { %1100 = vmatprep.subr.bf16.mxu0 %v5049_v44  ;;  %1326 = vmatprep.subr.bf16.mxu1 %v5051_v45  ;;  %v5142_v44 = vld [vmem:[#allocation11 + $0x300] ss:$16 sps:$4 sm:$0xff]   ;;  %v5145_v45 = vld [vmem:[#allocation11 + $0x308] ss:$16 sps:$4 sm:$0xff]  }
  0x78   :  { %1101 = vmatpush1.bf16.msra.mxu0 %v5053_v46  ;;  %1327 = vmatpush1.bf16.msra.mxu1 %v5054_v47  ;;  %v5150_v46 = vld [vmem:[#allocation11 + $0x324] ss:$16 sps:$4 sm:$0xff]   ;;  %v5153_v47 = vld [vmem:[#allocation11 + $0x32c] ss:$16 sps:$4 sm:$0xff]  }
  0x79   :  { %1102 = vmatprep.subr.bf16.mxu0 %v5055_v49  ;;  %1328 = vmatprep.subr.bf16.mxu1 %v5057_v50  ;;  %v5148_v49 = vld [vmem:[#allocation11 + $0x320] ss:$16 sps:$4 sm:$0xff]   ;;  %v5151_v50 = vld [vmem:[#allocation11 + $0x328] ss:$16 sps:$4 sm:$0xff]  }
  0x7c   :  { %1103 = vmatpush1.bf16.msra.mxu0 %v5059_v51  ;;  %1329 = vmatpush1.bf16.msra.mxu1 %v5060_v52  ;;  %v5159_v51 = vld [vmem:[#allocation11 + $0x344] ss:$16 sps:$4 sm:$0xff]   ;;  %v5162_v52 = vld [vmem:[#allocation11 + $0x34c] ss:$16 sps:$4 sm:$0xff]  }
  0x7d   :  { %1104 = vmatprep.subr.bf16.mxu0 %v5061_v53  ;;  %1330 = vmatprep.subr.bf16.mxu1 %v5063_v54  ;;  %v5156_v53 = vld [vmem:[#allocation10 + $0xa0] ss:$16 sps:$4 sm:$0xff]  }
  0x7e   :  { %v5157_v54 = vld [vmem:[#allocation11 + $0x340] ss:$16 sps:$4 sm:$0xff]  }
  0x80   :  { %1105 = vmatpush1.bf16.msra.mxu0 %v5065_v55  ;;  %1331 = vmatpush1.bf16.msra.mxu1 %v5066_v56  ;;  %v5160_v55 = vld [vmem:[#allocation11 + $0x348] ss:$16 sps:$4 sm:$0xff]   ;;  %v5165_v56 = vld [vmem:[#allocation11 + $0x364] ss:$16 sps:$4 sm:$0xff]  }
  0x81   :  { %1106 = vmatprep.subr.bf16.mxu0 %v5067_v57  ;;  %1332 = vmatprep.subr.bf16.mxu1 %v5069_v58  ;;  %v5168_v57 = vld [vmem:[#allocation11 + $0x36c] ss:$16 sps:$4 sm:$0xff]   ;;  %v5169_v58 = vld [vmem:[#allocation10 + $0xc4] ss:$16 sps:$4 sm:$0xff]  }
  0x84   :  { %1107 = vmatpush1.bf16.msra.mxu0 %v5071_v59  ;;  %1333 = vmatpush1.bf16.msra.mxu1 %v5072_v60  ;;  %v5163_v59 = vld [vmem:[#allocation11 + $0x360] ss:$16 sps:$4 sm:$0xff]   ;;  %v5166_v60 = vld [vmem:[#allocation11 + $0x368] ss:$16 sps:$4 sm:$0xff]  }
  0x85   :  { %1108 = vmatprep.subr.bf16.mxu0 %v5073_v61  ;;  %1334 = vmatprep.subr.bf16.mxu1 %v5075_v62  ;;  %v5174_v61 = vld [vmem:[#allocation11 + $0x384] ss:$16 sps:$4 sm:$0xff]   ;;  %v5177_v62 = vld [vmem:[#allocation11 + $0x38c] ss:$16 sps:$4 sm:$0xff]  }
  0x88   :  { %1109 = vmatpush1.bf16.msra.mxu0 %v5077_v63  ;;  %1335 = vmatpush1.bf16.msra.mxu1 %v5078_v0  ;;  %v5171_v63 = vld [vmem:[#allocation10 + $0xc0] ss:$16 sps:$4 sm:$0xff]  }
  0x89   :  { %1191 = vmatprep.subr.bf16.mxu0 %v5084_v1  ;;  %1417 = vmatprep.subr.bf16.mxu1 %v5087_v2  ;;  %v5172_v0 = vld [vmem:[#allocation11 + $0x380] ss:$16 sps:$4 sm:$0xff]   ;;  %v5175_v1 = vld [vmem:[#allocation11 + $0x388] ss:$16 sps:$4 sm:$0xff]   ;;  %v5180_v2 = vld [vmem:[#allocation11 + $0x3a4] ss:$16 sps:$4 sm:$0xff]  }
  0x8b   :  { %1111 = vmatmul.mubr.bf16.vlgmr.msra.gmra.mrb[0].mxu0 %v5079_v3  ;;  %1337 = vmatmul.mubr.bf16.vlgmr.msra.gmra.mrb[0].mxu1 %v5079_v3  ;;  %v5183_v3 = vld [vmem:[#allocation11 + $0x3ac] ss:$16 sps:$4 sm:$0xff]  }
  0x8c   :  { %1192 = vmatpush1.bf16.msra.mxu0 %v5082_v4  ;;  %1418 = vmatpush1.bf16.msra.mxu1 %v5085_v5  ;;  %v5184_v4 = vld [vmem:[#allocation10 + $0xe4] ss:$16 sps:$4 sm:$0xff]   ;;  %v5178_v5 = vld [vmem:[#allocation11 + $0x3a0] ss:$16 sps:$4 sm:$0xff]  }
  0x8d   :  { %1193 = vmatprep.subr.bf16.mxu0 %v5090_v6  ;;  %1419 = vmatprep.subr.bf16.mxu1 %v5093_v7  ;;  %v5181_v6 = vld [vmem:[#allocation11 + $0x3a8] ss:$16 sps:$4 sm:$0xff]   ;;  %v5189_v7 = vld [vmem:[#allocation11 + $0x3c4] ss:$16 sps:$4 sm:$0xff]  }
  0x8e   :  { %1120 = vmatprep.mubr.bf16.mxu0 %v5094_v8  ;;  %1346 = vmatprep.mubr.bf16.mxu1 %v5094_v8  ;;  %v5192_v8 = vld [vmem:[#allocation11 + $0x3cc] ss:$16 sps:$4 sm:$0xff]  }
  0x90   :  { %1194 = vmatpush1.bf16.msra.mxu0 %v5088_v9  ;;  %1420 = vmatpush1.bf16.msra.mxu1 %v5091_v10  ;;  %v5186_v9 = vld [vmem:[#allocation10 + $0xe0] ss:$16 sps:$4 sm:$0xff]  }
  0x91   :  { %1195 = vmatprep.subr.bf16.mxu0 %v5099_v11  ;;  %1421 = vmatprep.subr.bf16.mxu1 %v5102_v12  ;;  %v5187_v10 = vld [vmem:[#allocation11 + $0x3c0] ss:$16 sps:$4 sm:$0xff]   ;;  %v5190_v11 = vld [vmem:[#allocation11 + $0x3c8] ss:$16 sps:$4 sm:$0xff]   ;;  %v5195_v12 = vld [vmem:[#allocation11 + $0x3e4] ss:$16 sps:$4 sm:$0xff]  }
  0x93   :  { %1121 = vmatmul.mubr.bf16.gmra.mrb[4].mxu0 %v5096_v13  ;;  %1347 = vmatmul.mubr.bf16.gmra.mrb[4].mxu1 %v5096_v13  ;;  %v5198_v13 = vld [vmem:[#allocation11 + $0x3ec] ss:$16 sps:$4 sm:$0xff]  }
  0x94   :  { %1196 = vmatpush1.bf16.msra.mxu0 %v5097_v14  ;;  %1422 = vmatpush1.bf16.msra.mxu1 %v5100_v15  ;;  %v5201_v14 = vld [vmem:[#allocation10 + $0xc] ss:$16 sps:$4 sm:$0xff]   ;;  %v5193_v15 = vld [vmem:[#allocation11 + $0x3e0] ss:$16 sps:$4 sm:$0xff]  }
  0x95   :  { %1197 = vmatprep.subr.bf16.mxu0 %v5105_v16  ;;  %1423 = vmatprep.subr.bf16.mxu1 %v5108_v17  ;;  %v5196_v16 = vld [vmem:[#allocation11 + $0x3e8] ss:$16 sps:$4 sm:$0xff]   ;;  %v5204_v17 = vld [vmem:[#allocation8 + $0x4] ss:$16 sps:$4 sm:$0xff]  }
  0x96   :  { %1130 = vmatprep.mubr.bf16.mxu0 %v5109_v18  ;;  %1356 = vmatprep.mubr.bf16.mxu1 %v5109_v18  ;;  %v5207_v18 = vld [vmem:[#allocation8 + $0xc] ss:$16 sps:$4 sm:$0xff]  }
  0x98   :  { %1198 = vmatpush1.bf16.msra.mxu0 %v5103_v19  ;;  %1424 = vmatpush1.bf16.msra.mxu1 %v5106_v20  ;;  %v5199_v19 = vld [vmem:[#allocation10 + $0x8] ss:$16 sps:$4 sm:$0xff]   ;;  %v5202_v20 = vld [vmem:[#allocation8] ss:$16 sps:$4 sm:$0xff]  }
  0x99   :  { %1199 = vmatprep.subr.bf16.mxu0 %v5114_v21  ;;  %1425 = vmatprep.subr.bf16.mxu1 %v5117_v22  ;;  %v5205_v21 = vld [vmem:[#allocation8 + $0x8] ss:$16 sps:$4 sm:$0xff]   ;;  %v5210_v22 = vld [vmem:[#allocation8 + $0x24] ss:$16 sps:$4 sm:$0xff]  }
  0x9b   :  { %1131 = vmatmul.mubr.bf16.gmra.mrb[8].mxu0 %v5111_v23  ;;  %1357 = vmatmul.mubr.bf16.gmra.mrb[8].mxu1 %v5111_v23  ;;  %v5213_v23 = vld [vmem:[#allocation8 + $0x2c] ss:$16 sps:$4 sm:$0xff]  }
  0x9c   :  { %1200 = vmatpush1.bf16.msra.mxu0 %v5112_v24  ;;  %1426 = vmatpush1.bf16.msra.mxu1 %v5115_v25  ;;  %v5214_v24 = vld [vmem:[#allocation10 + $0x2c] ss:$16 sps:$4 sm:$0xff]   ;;  %v5208_v25 = vld [vmem:[#allocation8 + $0x20] ss:$16 sps:$4 sm:$0xff]  }
  0x9d   :  { %1201 = vmatprep.subr.bf16.mxu0 %v5120_v26  ;;  %1427 = vmatprep.subr.bf16.mxu1 %v5123_v27  ;;  %v5211_v26 = vld [vmem:[#allocation8 + $0x28] ss:$16 sps:$4 sm:$0xff]   ;;  %v5219_v27 = vld [vmem:[#allocation8 + $0x44] ss:$16 sps:$4 sm:$0xff]  }
  0x9e   :  { %1140 = vmatprep.mubr.bf16.mxu0 %v5124_v28  ;;  %1366 = vmatprep.mubr.bf16.mxu1 %v5124_v28  ;;  %v5222_v28 = vld [vmem:[#allocation8 + $0x4c] ss:$16 sps:$4 sm:$0xff]  }
  0xa0   :  { %1202 = vmatpush1.bf16.msra.mxu0 %v5118_v29  ;;  %1428 = vmatpush1.bf16.msra.mxu1 %v5121_v30  ;;  %v5216_v29 = vld [vmem:[#allocation10 + $0x28] ss:$16 sps:$4 sm:$0xff]   ;;  %v5217_v30 = vld [vmem:[#allocation8 + $0x40] ss:$16 sps:$4 sm:$0xff]  }
  0xa1   :  { %1203 = vmatprep.subr.bf16.mxu0 %v5129_v31  ;;  %1429 = vmatprep.subr.bf16.mxu1 %v5132_v32  ;;  %v5220_v31 = vld [vmem:[#allocation8 + $0x48] ss:$16 sps:$4 sm:$0xff]   ;;  %v5225_v32 = vld [vmem:[#allocation8 + $0x64] ss:$16 sps:$4 sm:$0xff]  }
  0xa3   :  { %1141 = vmatmul.mubr.bf16.gmra.mrb[12].mxu0 %v5126_v33  ;;  %1367 = vmatmul.mubr.bf16.gmra.mrb[12].mxu1 %v5126_v33  ;;  %v5228_v33 = vld [vmem:[#allocation8 + $0x6c] ss:$16 sps:$4 sm:$0xff]  }
  0xa4   :  { %1204 = vmatpush1.bf16.msra.mxu0 %v5127_v34  ;;  %1430 = vmatpush1.bf16.msra.mxu1 %v5130_v35  ;;  %v5229_v34 = vld [vmem:[#allocation10 + $0x4c] ss:$16 sps:$4 sm:$0xff]   ;;  %v5223_v35 = vld [vmem:[#allocation8 + $0x60] ss:$16 sps:$4 sm:$0xff]  }
  0xa5   :  { %1205 = vmatprep.subr.bf16.mxu0 %v5135_v36  ;;  %1431 = vmatprep.subr.bf16.mxu1 %v5138_v37  ;;  %v5226_v36 = vld [vmem:[#allocation8 + $0x68] ss:$16 sps:$4 sm:$0xff]   ;;  %v5234_v37 = vld [vmem:[#allocation8 + $0x84] ss:$16 sps:$4 sm:$0xff]  }
  0xa6   :  { %1150 = vmatprep.mubr.bf16.mxu0 %v5139_v38  ;;  %1376 = vmatprep.mubr.bf16.mxu1 %v5139_v38  ;;  %v5237_v38 = vld [vmem:[#allocation8 + $0x8c] ss:$16 sps:$4 sm:$0xff]  }
  0xa8   :  { %1206 = vmatpush1.bf16.msra.mxu0 %v5133_v39  ;;  %1432 = vmatpush1.bf16.msra.mxu1 %v5136_v40  ;;  %v5231_v39 = vld [vmem:[#allocation10 + $0x48] ss:$16 sps:$4 sm:$0xff]   ;;  %v5232_v40 = vld [vmem:[#allocation8 + $0x80] ss:$16 sps:$4 sm:$0xff]  }
  0xa9   :  { %1207 = vmatprep.subr.bf16.mxu0 %v5144_v41  ;;  %1433 = vmatprep.subr.bf16.mxu1 %v5147_v42  ;;  %v5235_v41 = vld [vmem:[#allocation8 + $0x88] ss:$16 sps:$4 sm:$0xff]   ;;  %v5240_v42 = vld [vmem:[#allocation8 + $0xa4] ss:$16 sps:$4 sm:$0xff]  }
  0xab   :  { %1151 = vmatmul.mubr.bf16.gmra.mrb[16].mxu0 %v5141_v43  ;;  %1377 = vmatmul.mubr.bf16.gmra.mrb[16].mxu1 %v5141_v43  ;;  %v5243_v43 = vld [vmem:[#allocation8 + $0xac] ss:$16 sps:$4 sm:$0xff]  }
  0xac   :  { %1208 = vmatpush1.bf16.msra.mxu0 %v5142_v44  ;;  %1434 = vmatpush1.bf16.msra.mxu1 %v5145_v45  ;;  %v5244_v44 = vld [vmem:[#allocation10 + $0x6c] ss:$16 sps:$4 sm:$0xff]   ;;  %v5238_v45 = vld [vmem:[#allocation8 + $0xa0] ss:$16 sps:$4 sm:$0xff]  }
  0xad   :  { %1209 = vmatprep.subr.bf16.mxu0 %v5150_v46  ;;  %1435 = vmatprep.subr.bf16.mxu1 %v5153_v47  ;;  %v5241_v46 = vld [vmem:[#allocation8 + $0xa8] ss:$16 sps:$4 sm:$0xff]   ;;  %v5249_v47 = vld [vmem:[#allocation8 + $0xc4] ss:$16 sps:$4 sm:$0xff]  }
  0xae   :  { %1160 = vmatprep.mubr.bf16.mxu0 %v5154_v48  ;;  %1386 = vmatprep.mubr.bf16.mxu1 %v5154_v48  ;;  %v5252_v48 = vld [vmem:[#allocation8 + $0xcc] ss:$16 sps:$4 sm:$0xff]  }
  0xb0   :  { %1210 = vmatpush1.bf16.msra.mxu0 %v5148_v49  ;;  %1436 = vmatpush1.bf16.msra.mxu1 %v5151_v50  ;;  %v5246_v49 = vld [vmem:[#allocation10 + $0x68] ss:$16 sps:$4 sm:$0xff]   ;;  %v5247_v50 = vld [vmem:[#allocation8 + $0xc0] ss:$16 sps:$4 sm:$0xff]  }
  0xb1   :  { %1211 = vmatprep.subr.bf16.mxu0 %v5159_v51  ;;  %1437 = vmatprep.subr.bf16.mxu1 %v5162_v52  ;;  %v5250_v51 = vld [vmem:[#allocation8 + $0xc8] ss:$16 sps:$4 sm:$0xff]   ;;  %v5255_v52 = vld [vmem:[#allocation8 + $0xe4] ss:$16 sps:$4 sm:$0xff]  }
  0xb3   :  { %1161 = vmatmul.mubr.bf16.gmra.mrb[20].mxu0 %v5156_v53  ;;  %1387 = vmatmul.mubr.bf16.gmra.mrb[20].mxu1 %v5156_v53  ;;  %v5258_v53 = vld [vmem:[#allocation8 + $0xec] ss:$16 sps:$4 sm:$0xff]  }
  0xb4   :  { %1212 = vmatpush1.bf16.msra.mxu0 %v5157_v54  ;;  %1438 = vmatpush1.bf16.msra.mxu1 %v5160_v55  ;;  %v5259_v54 = vld [vmem:[#allocation10 + $0x8c] ss:$16 sps:$4 sm:$0xff]   ;;  %v5253_v55 = vld [vmem:[#allocation8 + $0xe0] ss:$16 sps:$4 sm:$0xff]  }
  0xb5   :  { %1213 = vmatprep.subr.bf16.mxu0 %v5165_v56  ;;  %1439 = vmatprep.subr.bf16.mxu1 %v5168_v57  ;;  %v5256_v56 = vld [vmem:[#allocation8 + $0xe8] ss:$16 sps:$4 sm:$0xff]   ;;  %v5264_v57 = vld [vmem:[#allocation8 + $0x104] ss:$16 sps:$4 sm:$0xff]  }
  0xb6   :  { %1170 = vmatprep.mubr.bf16.mxu0 %v5169_v58  ;;  %1396 = vmatprep.mubr.bf16.mxu1 %v5169_v58  ;;  %v5267_v58 = vld [vmem:[#allocation8 + $0x10c] ss:$16 sps:$4 sm:$0xff]  }
  0xb8   :  { %1214 = vmatpush1.bf16.msra.mxu0 %v5163_v59  ;;  %1440 = vmatpush1.bf16.msra.mxu1 %v5166_v60  ;;  %v5261_v59 = vld [vmem:[#allocation10 + $0x88] ss:$16 sps:$4 sm:$0xff]   ;;  %v5262_v60 = vld [vmem:[#allocation8 + $0x100] ss:$16 sps:$4 sm:$0xff]  }
  0xb9   :  { %1215 = vmatprep.subr.bf16.mxu0 %v5174_v61  ;;  %1441 = vmatprep.subr.bf16.mxu1 %v5177_v62  ;;  %v5265_v61 = vld [vmem:[#allocation8 + $0x108] ss:$16 sps:$4 sm:$0xff]   ;;  %v5270_v62 = vld [vmem:[#allocation8 + $0x124] ss:$16 sps:$4 sm:$0xff]  }
  0xbb   :  { %1171 = vmatmul.mubr.bf16.gmra.mrb[24].mxu0 %v5171_v63  ;;  %1397 = vmatmul.mubr.bf16.gmra.mrb[24].mxu1 %v5171_v63  ;;  %v5273_v63 = vld [vmem:[#allocation8 + $0x12c] ss:$16 sps:$4 sm:$0xff]  }
  0xbc   :  { %1216 = vmatpush1.bf16.msra.mxu0 %v5172_v0  ;;  %1442 = vmatpush1.bf16.msra.mxu1 %v5175_v1  ;;  %v5274_v0 = vld [vmem:[#allocation10 + $0xac] ss:$16 sps:$4 sm:$0xff]   ;;  %v5268_v1 = vld [vmem:[#allocation8 + $0x120] ss:$16 sps:$4 sm:$0xff]  }
  0xbd   :  { %1217 = vmatprep.subr.bf16.mxu0 %v5180_v2  ;;  %1443 = vmatprep.subr.bf16.mxu1 %v5183_v3  ;;  %v5271_v2 = vld [vmem:[#allocation8 + $0x128] ss:$16 sps:$4 sm:$0xff]   ;;  %v5279_v3 = vld [vmem:[#allocation8 + $0x144] ss:$16 sps:$4 sm:$0xff]  }
  0xbe   :  { %1180 = vmatprep.mubr.bf16.mxu0 %v5184_v4  ;;  %1406 = vmatprep.mubr.bf16.mxu1 %v5184_v4  ;;  %v5282_v4 = vld [vmem:[#allocation8 + $0x14c] ss:$16 sps:$4 sm:$0xff]  }
  0xc0   :  { %1218 = vmatpush1.bf16.msra.mxu0 %v5178_v5  ;;  %1444 = vmatpush1.bf16.msra.mxu1 %v5181_v6  ;;  %v5276_v5 = vld [vmem:[#allocation10 + $0xa8] ss:$16 sps:$4 sm:$0xff]   ;;  %v5277_v6 = vld [vmem:[#allocation8 + $0x140] ss:$16 sps:$4 sm:$0xff]  }
  0xc1   :  { %1219 = vmatprep.subr.bf16.mxu0 %v5189_v7  ;;  %1445 = vmatprep.subr.bf16.mxu1 %v5192_v8  ;;  %v5280_v7 = vld [vmem:[#allocation8 + $0x148] ss:$16 sps:$4 sm:$0xff]   ;;  %v5285_v8 = vld [vmem:[#allocation8 + $0x164] ss:$16 sps:$4 sm:$0xff]  }
  0xc3   :  { %1181 = vmatmul.mubr.bf16.gmra.mrb[28].mxu0 %v5186_v9  ;;  %1407 = vmatmul.mubr.bf16.gmra.mrb[28].mxu1 %v5186_v9  ;;  %v5288_v9 = vld [vmem:[#allocation8 + $0x16c] ss:$16 sps:$4 sm:$0xff]  }
  0xc4   :  { %1220 = vmatpush1.bf16.msra.mxu0 %v5187_v10  ;;  %1446 = vmatpush1.bf16.msra.mxu1 %v5190_v11  ;;  %v5289_v10 = vld [vmem:[#allocation10 + $0xcc] ss:$16 sps:$4 sm:$0xff]   ;;  %v5283_v11 = vld [vmem:[#allocation8 + $0x160] ss:$16 sps:$4 sm:$0xff]  }
  0xc5   :  { %1221 = vmatprep.subr.bf16.mxu0 %v5195_v12  ;;  %1447 = vmatprep.subr.bf16.mxu1 %v5198_v13  ;;  %v5286_v12 = vld [vmem:[#allocation8 + $0x168] ss:$16 sps:$4 sm:$0xff]   ;;  %v5294_v13 = vld [vmem:[#allocation8 + $0x184] ss:$16 sps:$4 sm:$0xff]  }
  0xc6   :  { %1223 = vmatprep.mubr.bf16.mxu0 %v5201_v14  ;;  %1449 = vmatprep.mubr.bf16.mxu1 %v5201_v14  ;;  %v5297_v14 = vld [vmem:[#allocation8 + $0x18c] ss:$16 sps:$4 sm:$0xff]  }
  0xc8   :  { %1222 = vmatpush1.bf16.msra.mxu0 %v5193_v15  ;;  %1448 = vmatpush1.bf16.msra.mxu1 %v5196_v16  ;;  %v5291_v15 = vld [vmem:[#allocation10 + $0xc8] ss:$16 sps:$4 sm:$0xff]   ;;  %v5292_v16 = vld [vmem:[#allocation8 + $0x180] ss:$16 sps:$4 sm:$0xff]  }
  0xc9   :  { %3554 = vmatprep.subr.bf16.mxu0 %v5204_v17  ;;  %3726 = vmatprep.subr.bf16.mxu1 %v5207_v18  ;;  %v5295_v17 = vld [vmem:[#allocation8 + $0x188] ss:$16 sps:$4 sm:$0xff]   ;;  %v5300_v18 = vld [vmem:[#allocation8 + $0x1a4] ss:$16 sps:$4 sm:$0xff]  }
  0xcb   :  { %1224 = vmatmul.mubr.bf16.vlgmr.msra.gmra.mrb[0].mxu0 %v5199_v19  ;;  %1450 = vmatmul.mubr.bf16.vlgmr.msra.gmra.mrb[0].mxu1 %v5199_v19  ;;  %v5303_v19 = vld [vmem:[#allocation8 + $0x1ac] ss:$16 sps:$4 sm:$0xff]  }
  0xcc   :  { %3555 = vmatpush1.bf16.msra.mxu0 %v5202_v20  ;;  %3727 = vmatpush1.bf16.msra.mxu1 %v5205_v21  ;;  %v5304_v20 = vld [vmem:[#allocation10 + $0xec] ss:$16 sps:$4 sm:$0xff]   ;;  %v5298_v21 = vld [vmem:[#allocation8 + $0x1a0] ss:$16 sps:$4 sm:$0xff]  }
  0xcd   :  { %3556 = vmatprep.subr.bf16.mxu0 %v5210_v22  ;;  %3728 = vmatprep.subr.bf16.mxu1 %v5213_v23  ;;  %v5301_v22 = vld [vmem:[#allocation8 + $0x1a8] ss:$16 sps:$4 sm:$0xff]  }
  0xce   :  { %1233 = vmatprep.mubr.bf16.mxu0 %v5214_v24  ;;  %1459 = vmatprep.mubr.bf16.mxu1 %v5214_v24  ;;  %v5306_v23 = vld [vmem:[#allocation10 + $0xe8] ss:$16 sps:$4 sm:$0xff]   ;;  %v5309_v24 = vld [vmem:[#allocation8 + $0x1c4] ss:$16 sps:$4 sm:$0xff]  }
  0xd0   :  { %3557 = vmatpush1.bf16.msra.mxu0 %v5208_v25  ;;  %3729 = vmatpush1.bf16.msra.mxu1 %v5211_v26  ;;  %v5312_v25 = vld [vmem:[#allocation8 + $0x1cc] ss:$16 sps:$4 sm:$0xff]   ;;  %v1970_v26 = vld [vmem:[#allocation5] sm:$0xff] }
  0xd1   :  { %3558 = vmatprep.subr.bf16.mxu0 %v5219_v27  ;;  %3730 = vmatprep.subr.bf16.mxu1 %v5222_v28  ;;  %v1974_v27 = vld [vmem:[#allocation5 + $0x20] sm:$0xff] }
  0xd2   :  { %v5307_v28 = vld [vmem:[#allocation8 + $0x1c0] ss:$16 sps:$4 sm:$0xff]  }
  0xd3   :  { %1234 = vmatmul.mubr.bf16.gmra.mrb[4].mxu0 %v5216_v29  ;;  %1460 = vmatmul.mubr.bf16.gmra.mrb[4].mxu1 %v5216_v29  ;;  %v5310_v29 = vld [vmem:[#allocation8 + $0x1c8] ss:$16 sps:$4 sm:$0xff]  }
  0xd4   :  { %3559 = vmatpush1.bf16.msra.mxu0 %v5217_v30  ;;  %3731 = vmatpush1.bf16.msra.mxu1 %v5220_v31  ;;  %v5315_v30 = vld [vmem:[#allocation8 + $0x1e4] ss:$16 sps:$4 sm:$0xff]   ;;  %v5318_v31 = vld [vmem:[#allocation8 + $0x1ec] ss:$16 sps:$4 sm:$0xff]  }
  0xd5   :  { %3560 = vmatprep.subr.bf16.mxu0 %v5225_v32  ;;  %3732 = vmatprep.subr.bf16.mxu1 %v5228_v33  ;;  %v4289_v32 = vcombine.high %v1970_v26, %v1974_v27  ;;  %v5313_v33 = vld [vmem:[#allocation8 + $0x1e0] ss:$16 sps:$4 sm:$0xff]  }
  0xd6   :  { %1243 = vmatprep.mubr.bf16.mxu0 %v5229_v34  ;;  %1469 = vmatprep.mubr.bf16.mxu1 %v5229_v34  ;;  %v5316_v34 = vld [vmem:[#allocation8 + $0x1e8] ss:$16 sps:$4 sm:$0xff]  }
  0xd8   :  { %3561 = vmatpush1.bf16.msra.mxu0 %v5223_v35  ;;  %3733 = vmatpush1.bf16.msra.mxu1 %v5226_v36  ;;  %v5321_v35 = vld [vmem:[#allocation8 + $0x204] ss:$16 sps:$4 sm:$0xff]   ;;  %v5324_v36 = vld [vmem:[#allocation8 + $0x20c] ss:$16 sps:$4 sm:$0xff]  }
  0xd9   :  { %3562 = vmatprep.subr.bf16.mxu0 %v5234_v37  ;;  %3734 = vmatprep.subr.bf16.mxu1 %v5237_v38  ;;  %v5319_v37 = vld [vmem:[#allocation8 + $0x200] ss:$16 sps:$4 sm:$0xff]   ;;  %v4288_v38 = vcombine.low %v1970_v26, %v1974_v27  ;;  %v5394_v26 = vld [vmem:[#allocation8 + $0x388] ss:$16 sps:$4 sm:$0xff]   ;;  %v5399_v27 = vld [vmem:[#allocation8 + $0x3a4] ss:$16 sps:$4 sm:$0xff]  }
  0xdb   :  { %1244 = vmatmul.mubr.bf16.gmra.mrb[8].mxu0 %v5231_v39  ;;  %1470 = vmatmul.mubr.bf16.gmra.mrb[8].mxu1 %v5231_v39  ;;  %v5322_v39 = vld [vmem:[#allocation8 + $0x208] ss:$16 sps:$4 sm:$0xff]  }
  0xdc   :  { %3563 = vmatpush1.bf16.msra.mxu0 %v5232_v40  ;;  %3735 = vmatpush1.bf16.msra.mxu1 %v5235_v41  ;;  %v5327_v40 = vld [vmem:[#allocation8 + $0x224] ss:$16 sps:$4 sm:$0xff]   ;;  %v5330_v41 = vld [vmem:[#allocation8 + $0x22c] ss:$16 sps:$4 sm:$0xff]  }
  0xdd   :  { %3564 = vmatprep.subr.bf16.mxu0 %v5240_v42  ;;  %3736 = vmatprep.subr.bf16.mxu1 %v5243_v43  ;;  %v5876_v42 = vld [vmem:[#allocation5 + $0x8] sm:$0xff] }
  0xde   :  { %1253 = vmatprep.mubr.bf16.mxu0 %v5244_v44  ;;  %1479 = vmatprep.mubr.bf16.mxu1 %v5244_v44  ;;  %v5878_v43 = vld [vmem:[#allocation5 + $0x28] sm:$0xff] }
  0xdf   :  { %v4291_v44 = vcombine.high %v5876_v42, %v5878_v43 }
  0xe0   :  { %3565 = vmatpush1.bf16.msra.mxu0 %v5238_v45  ;;  %3737 = vmatpush1.bf16.msra.mxu1 %v5241_v46  ;;  %v5325_v45 = vld [vmem:[#allocation8 + $0x220] ss:$16 sps:$4 sm:$0xff]   ;;  %v5328_v46 = vld [vmem:[#allocation8 + $0x228] ss:$16 sps:$4 sm:$0xff]  }
  0xe1   :  { %3566 = vmatprep.subr.bf16.mxu0 %v5249_v47  ;;  %3738 = vmatprep.subr.bf16.mxu1 %v5252_v48  ;;  %v5333_v47 = vld [vmem:[#allocation8 + $0x244] ss:$16 sps:$4 sm:$0xff]   ;;  %v5336_v48 = vld [vmem:[#allocation8 + $0x24c] ss:$16 sps:$4 sm:$0xff]  }
  0xe3   :  { %1254 = vmatmul.mubr.bf16.gmra.mrb[12].mxu0 %v5246_v49  ;;  %1480 = vmatmul.mubr.bf16.gmra.mrb[12].mxu1 %v5246_v49  ;;  %v5331_v49 = vld [vmem:[#allocation8 + $0x240] ss:$16 sps:$4 sm:$0xff]  }
  0xe4   :  { %3567 = vmatpush1.bf16.msra.mxu0 %v5247_v50  ;;  %3739 = vmatpush1.bf16.msra.mxu1 %v5250_v51  ;;  %v5334_v50 = vld [vmem:[#allocation8 + $0x248] ss:$16 sps:$4 sm:$0xff]   ;;  %v5339_v51 = vld [vmem:[#allocation8 + $0x264] ss:$16 sps:$4 sm:$0xff]  }
  0xe5   :  { %3568 = vmatprep.subr.bf16.mxu0 %v5255_v52  ;;  %3740 = vmatprep.subr.bf16.mxu1 %v5258_v53  ;;  %v5342_v52 = vld [vmem:[#allocation8 + $0x26c] ss:$16 sps:$4 sm:$0xff]   ;;  %v5337_v53 = vld [vmem:[#allocation8 + $0x260] ss:$16 sps:$4 sm:$0xff]  }
  0xe6   :  { %1263 = vmatprep.mubr.bf16.mxu0 %v5259_v54  ;;  %1489 = vmatprep.mubr.bf16.mxu1 %v5259_v54  ;;  %v5340_v54 = vld [vmem:[#allocation8 + $0x268] ss:$16 sps:$4 sm:$0xff]  }
  0xe8   :  { %3569 = vmatpush1.bf16.msra.mxu0 %v5253_v55  ;;  %3741 = vmatpush1.bf16.msra.mxu1 %v5256_v56  ;;  %v5345_v55 = vld [vmem:[#allocation8 + $0x284] ss:$16 sps:$4 sm:$0xff]   ;;  %v5348_v56 = vld [vmem:[#allocation8 + $0x28c] ss:$16 sps:$4 sm:$0xff]  }
  0xe9   :  { %3570 = vmatprep.subr.bf16.mxu0 %v5264_v57  ;;  %3742 = vmatprep.subr.bf16.mxu1 %v5267_v58  ;;  %v5343_v57 = vld [vmem:[#allocation8 + $0x280] ss:$16 sps:$4 sm:$0xff]   ;;  %v5346_v58 = vld [vmem:[#allocation8 + $0x288] ss:$16 sps:$4 sm:$0xff]  }
  0xeb   :  { %1264 = vmatmul.mubr.bf16.gmra.mrb[16].mxu0 %v5261_v59  ;;  %1490 = vmatmul.mubr.bf16.gmra.mrb[16].mxu1 %v5261_v59  ;;  %v5351_v59 = vld [vmem:[#allocation8 + $0x2a4] ss:$16 sps:$4 sm:$0xff]  }
  0xec   :  { %3571 = vmatpush1.bf16.msra.mxu0 %v5262_v60  ;;  %3743 = vmatpush1.bf16.msra.mxu1 %v5265_v61  ;;  %v5354_v60 = vld [vmem:[#allocation8 + $0x2ac] ss:$16 sps:$4 sm:$0xff]   ;;  %v5349_v61 = vld [vmem:[#allocation8 + $0x2a0] ss:$16 sps:$4 sm:$0xff]  }
  0xed   :  { %3572 = vmatprep.subr.bf16.mxu0 %v5270_v62  ;;  %3744 = vmatprep.subr.bf16.mxu1 %v5273_v63  ;;  %v5352_v62 = vld [vmem:[#allocation8 + $0x2a8] ss:$16 sps:$4 sm:$0xff]   ;;  %v5357_v63 = vld [vmem:[#allocation8 + $0x2c4] ss:$16 sps:$4 sm:$0xff]  }
  0xee   :  { %1273 = vmatprep.mubr.bf16.mxu0 %v5274_v0  ;;  %1499 = vmatprep.mubr.bf16.mxu1 %v5274_v0  ;;  %v5360_v0 = vld [vmem:[#allocation8 + $0x2cc] ss:$16 sps:$4 sm:$0xff]  }
  0xf0   :  { %3573 = vmatpush1.bf16.msra.mxu0 %v5268_v1  ;;  %3745 = vmatpush1.bf16.msra.mxu1 %v5271_v2  ;;  %v5355_v1 = vld [vmem:[#allocation8 + $0x2c0] ss:$16 sps:$4 sm:$0xff]   ;;  %v5358_v2 = vld [vmem:[#allocation8 + $0x2c8] ss:$16 sps:$4 sm:$0xff]  }
  0xf1   :  { %3574 = vmatprep.subr.bf16.mxu0 %v5279_v3  ;;  %3746 = vmatprep.subr.bf16.mxu1 %v5282_v4  ;;  %v5363_v3 = vld [vmem:[#allocation8 + $0x2e4] ss:$16 sps:$4 sm:$0xff]   ;;  %v5366_v4 = vld [vmem:[#allocation8 + $0x2ec] ss:$16 sps:$4 sm:$0xff]  }
  0xf3   :  { %1274 = vmatmul.mubr.bf16.gmra.mrb[20].mxu0 %v5276_v5  ;;  %1500 = vmatmul.mubr.bf16.gmra.mrb[20].mxu1 %v5276_v5  ;;  %v5361_v5 = vld [vmem:[#allocation8 + $0x2e0] ss:$16 sps:$4 sm:$0xff]  }
  0xf4   :  { %3575 = vmatpush1.bf16.msra.mxu0 %v5277_v6  ;;  %3747 = vmatpush1.bf16.msra.mxu1 %v5280_v7  ;;  %v5364_v6 = vld [vmem:[#allocation8 + $0x2e8] ss:$16 sps:$4 sm:$0xff]   ;;  %v5369_v7 = vld [vmem:[#allocation8 + $0x304] ss:$16 sps:$4 sm:$0xff]  }
  0xf5   :  { %3576 = vmatprep.subr.bf16.mxu0 %v5285_v8  ;;  %3748 = vmatprep.subr.bf16.mxu1 %v5288_v9  ;;  %v5372_v8 = vld [vmem:[#allocation8 + $0x30c] ss:$16 sps:$4 sm:$0xff]   ;;  %v5367_v9 = vld [vmem:[#allocation8 + $0x300] ss:$16 sps:$4 sm:$0xff]  }
  0xf6   :  { %1283 = vmatprep.mubr.bf16.mxu0 %v5289_v10  ;;  %1509 = vmatprep.mubr.bf16.mxu1 %v5289_v10  ;;  %v5370_v10 = vld [vmem:[#allocation8 + $0x308] ss:$16 sps:$4 sm:$0xff]  }
  0xf8   :  { %3577 = vmatpush1.bf16.msra.mxu0 %v5283_v11  ;;  %3749 = vmatpush1.bf16.msra.mxu1 %v5286_v12  ;;  %v5375_v11 = vld [vmem:[#allocation8 + $0x324] ss:$16 sps:$4 sm:$0xff]   ;;  %v5378_v12 = vld [vmem:[#allocation8 + $0x32c] ss:$16 sps:$4 sm:$0xff]  }
  0xf9   :  { %3578 = vmatprep.subr.bf16.mxu0 %v5294_v13  ;;  %3750 = vmatprep.subr.bf16.mxu1 %v5297_v14  ;;  %v5373_v13 = vld [vmem:[#allocation8 + $0x320] ss:$16 sps:$4 sm:$0xff]   ;;  %v5376_v14 = vld [vmem:[#allocation8 + $0x328] ss:$16 sps:$4 sm:$0xff]  }
  0xfb   :  { %1284 = vmatmul.mubr.bf16.gmra.mrb[24].mxu0 %v5291_v15  ;;  %1510 = vmatmul.mubr.bf16.gmra.mrb[24].mxu1 %v5291_v15  ;;  %v5381_v15 = vld [vmem:[#allocation8 + $0x344] ss:$16 sps:$4 sm:$0xff]  }
  0xfc   :  { %3579 = vmatpush1.bf16.msra.mxu0 %v5292_v16  ;;  %3751 = vmatpush1.bf16.msra.mxu1 %v5295_v17  ;;  %v5384_v16 = vld [vmem:[#allocation8 + $0x34c] ss:$16 sps:$4 sm:$0xff]   ;;  %v5379_v17 = vld [vmem:[#allocation8 + $0x340] ss:$16 sps:$4 sm:$0xff]  }
  0xfd   :  { %3580 = vmatprep.subr.bf16.mxu0 %v5300_v18  ;;  %3752 = vmatprep.subr.bf16.mxu1 %v5303_v19  ;;  %v5382_v18 = vld [vmem:[#allocation8 + $0x348] ss:$16 sps:$4 sm:$0xff]   ;;  %v5387_v19 = vld [vmem:[#allocation8 + $0x364] ss:$16 sps:$4 sm:$0xff]  }
  0xfe   :  { %1293 = vmatprep.mubr.bf16.mxu0 %v5304_v20  ;;  %1519 = vmatprep.mubr.bf16.mxu1 %v5304_v20  ;;  %v5390_v20 = vld [vmem:[#allocation8 + $0x36c] ss:$16 sps:$4 sm:$0xff]  }
 0x100   :  { %3581 = vmatpush1.bf16.msra.mxu0 %v5298_v21  ;;  %3753 = vmatpush1.bf16.msra.mxu1 %v5301_v22  ;;  %v5385_v21 = vld [vmem:[#allocation8 + $0x360] ss:$16 sps:$4 sm:$0xff]   ;;  %v5388_v22 = vld [vmem:[#allocation8 + $0x368] ss:$16 sps:$4 sm:$0xff]  }
 0x101   :  { %3582 = vmatprep.subr.bf16.mxu0 %v5309_v24  ;;  %3754 = vmatprep.subr.bf16.mxu1 %v5312_v25  ;;  %v5396_v24 = vld [vmem:[#allocation8 + $0x38c] ss:$16 sps:$4 sm:$0xff]   ;;  %v5391_v25 = vld [vmem:[#allocation8 + $0x380] ss:$16 sps:$4 sm:$0xff]  }
 0x103   :  { %1294 = vmatmul.mubr.bf16.gmra.mrb[28].mxu0 %v5306_v23  ;;  %1520 = vmatmul.mubr.bf16.gmra.mrb[28].mxu1 %v5306_v23  ;;  %v5393_v23 = vld [vmem:[#allocation8 + $0x384] ss:$16 sps:$4 sm:$0xff]  }
 0x104   :  { %3583 = vmatpush1.bf16.msra.mxu0 %v5307_v28  ;;  %3755 = vmatpush1.bf16.msra.mxu1 %v5310_v29  ;;  %v5402_v28 = vld [vmem:[#allocation8 + $0x3ac] ss:$16 sps:$4 sm:$0xff]   ;;  %v5397_v29 = vld [vmem:[#allocation8 + $0x3a0] ss:$16 sps:$4 sm:$0xff]  }
 0x105   :  { %3584 = vmatprep.subr.bf16.mxu0 %v5315_v30  ;;  %3756 = vmatprep.subr.bf16.mxu1 %v5318_v31  ;;  %v5400_v30 = vld [vmem:[#allocation8 + $0x3a8] ss:$16 sps:$4 sm:$0xff]   ;;  %v5405_v31 = vld [vmem:[#allocation8 + $0x3c4] ss:$16 sps:$4 sm:$0xff]  }
 0x106   :  { %3586 = vmatprep.mubr.bf16.mxu0 %v4289_v32  ;;  %3758 = vmatprep.mubr.bf16.mxu1 %v4289_v32  ;;  %v5408_v32 = vld [vmem:[#allocation8 + $0x3cc] ss:$16 sps:$4 sm:$0xff]  }
 0x108   :  { %3585 = vmatpush1.bf16.msra.mxu0 %v5313_v33  ;;  %3757 = vmatpush1.bf16.msra.mxu1 %v5316_v34  ;;  %v5403_v33 = vld [vmem:[#allocation8 + $0x3c0] ss:$16 sps:$4 sm:$0xff]   ;;  %v5406_v34 = vld [vmem:[#allocation8 + $0x3c8] ss:$16 sps:$4 sm:$0xff]  }
 0x109   :  { %3597 = vmatprep.subr.bf16.mxu0 %v5321_v35  ;;  %3769 = vmatprep.subr.bf16.mxu1 %v5324_v36  ;;  %v5411_v35 = vld [vmem:[#allocation8 + $0x3e4] ss:$16 sps:$4 sm:$0xff]   ;;  %v5414_v36 = vld [vmem:[#allocation8 + $0x3ec] ss:$16 sps:$4 sm:$0xff]  }
 0x10b   :  { %3587 = vmatmul.mubr.bf16.vlgmr.msra.gmra.mrb[32].mxu0 %v4288_v38  ;;  %3759 = vmatmul.mubr.bf16.vlgmr.msra.gmra.mrb[32].mxu1 %v4288_v38  ;;  %v5412_v38 = vld [vmem:[#allocation8 + $0x3e8] ss:$16 sps:$4 sm:$0xff]  }
 0x10c   :  { %3598 = vmatpush1.bf16.msra.mxu0 %v5319_v37  ;;  %3770 = vmatpush1.bf16.msra.mxu1 %v5322_v39  ;;  %v5409_v37 = vld [vmem:[#allocation8 + $0x3e0] ss:$16 sps:$4 sm:$0xff]   ;;  %v5417_v39 = vld [vmem:[#allocation8 + $0x404] ss:$16 sps:$4 sm:$0xff]  }
 0x10d   :  { %3599 = vmatprep.subr.bf16.mxu0 %v5327_v40  ;;  %3771 = vmatprep.subr.bf16.mxu1 %v5330_v41  ;;  %v5420_v40 = vld [vmem:[#allocation8 + $0x40c] ss:$16 sps:$4 sm:$0xff]   ;;  %v5415_v41 = vld [vmem:[#allocation8 + $0x400] ss:$16 sps:$4 sm:$0xff]  }
 0x10e   :  { %3629 = vmatprep.mubr.bf16.mxu0 %v4291_v44  ;;  %3801 = vmatprep.mubr.bf16.mxu1 %v4291_v44  ;;  %v4290_v44 = vcombine.low %v5876_v42, %v5878_v43  ;;  %v5424_v42 = vld [vmem:[#allocation8 + $0x428] ss:$16 sps:$4 sm:$0xff]   ;;  %v5429_v43 = vld [vmem:[#allocation8 + $0x444] ss:$16 sps:$4 sm:$0xff]  }
 0x110   :  { %3600 = vmatpush1.bf16.msra.mxu0 %v5325_v45  ;;  %3772 = vmatpush1.bf16.msra.mxu1 %v5328_v46  ;;  %v5884_v45 = vld [vmem:[#allocation5 + $0x10] sm:$0xff] }
 0x111   :  { %3601 = vmatprep.subr.bf16.mxu0 %v5333_v47  ;;  %3773 = vmatprep.subr.bf16.mxu1 %v5336_v48  ;;  %v5886_v46 = vld [vmem:[#allocation5 + $0x30] sm:$0xff]  ;;  %v5418_v47 = vld [vmem:[#allocation8 + $0x408] ss:$16 sps:$4 sm:$0xff]  }
 0x112   :  { %v5423_v48 = vld [vmem:[#allocation8 + $0x424] ss:$16 sps:$4 sm:$0xff]  }
 0x114   :  { %3602 = vmatpush1.bf16.msra.mxu0 %v5331_v49  ;;  %3774 = vmatpush1.bf16.msra.mxu1 %v5334_v50  ;;  %v5426_v49 = vld [vmem:[#allocation8 + $0x42c] ss:$16 sps:$4 sm:$0xff]   ;;  %v4293_v50 = vcombine.high %v5884_v45, %v5886_v46 }
 0x115   :  { %3603 = vmatprep.subr.bf16.mxu0 %v5339_v51  ;;  %3775 = vmatprep.subr.bf16.mxu1 %v5342_v52  ;;  %v5421_v51 = vld [vmem:[#allocation8 + $0x420] ss:$16 sps:$4 sm:$0xff]   ;;  %v5432_v52 = vld [vmem:[#allocation8 + $0x44c] ss:$16 sps:$4 sm:$0xff]  }
 0x118   :  { %3604 = vmatpush1.bf16.msra.mxu0 %v5337_v53  ;;  %3776 = vmatpush1.bf16.msra.mxu1 %v5340_v54  ;;  %v5427_v53 = vld [vmem:[#allocation8 + $0x440] ss:$16 sps:$4 sm:$0xff]   ;;  %v5430_v54 = vld [vmem:[#allocation8 + $0x448] ss:$16 sps:$4 sm:$0xff]  }
 0x119   :  { %3605 = vmatprep.subr.bf16.mxu0 %v5345_v55  ;;  %3777 = vmatprep.subr.bf16.mxu1 %v5348_v56  ;;  %v5435_v55 = vld [vmem:[#allocation8 + $0x464] ss:$16 sps:$4 sm:$0xff]   ;;  %v5438_v56 = vld [vmem:[#allocation8 + $0x46c] ss:$16 sps:$4 sm:$0xff]  }
 0x11c   :  { %3606 = vmatpush1.bf16.msra.mxu0 %v5343_v57  ;;  %3778 = vmatpush1.bf16.msra.mxu1 %v5346_v58  ;;  %v5433_v57 = vld [vmem:[#allocation8 + $0x460] ss:$16 sps:$4 sm:$0xff]   ;;  %v5436_v58 = vld [vmem:[#allocation8 + $0x468] ss:$16 sps:$4 sm:$0xff]  }
 0x11d   :  { %3607 = vmatprep.subr.bf16.mxu0 %v5351_v59  ;;  %3779 = vmatprep.subr.bf16.mxu1 %v5354_v60  ;;  %v5441_v59 = vld [vmem:[#allocation8 + $0x484] ss:$16 sps:$4 sm:$0xff]   ;;  %v5444_v60 = vld [vmem:[#allocation8 + $0x48c] ss:$16 sps:$4 sm:$0xff]  }
 0x120   :  { %3608 = vmatpush1.bf16.msra.mxu0 %v5349_v61  ;;  %3780 = vmatpush1.bf16.msra.mxu1 %v5352_v62  ;;  %v5439_v61 = vld [vmem:[#allocation8 + $0x480] ss:$16 sps:$4 sm:$0xff]   ;;  %v5442_v62 = vld [vmem:[#allocation8 + $0x488] ss:$16 sps:$4 sm:$0xff]  }
 0x121   :  { %3609 = vmatprep.subr.bf16.mxu0 %v5357_v63  ;;  %3781 = vmatprep.subr.bf16.mxu1 %v5360_v0  ;;  %v5447_v63 = vld [vmem:[#allocation8 + $0x4a4] ss:$16 sps:$4 sm:$0xff]   ;;  %v5450_v0 = vld [vmem:[#allocation8 + $0x4ac] ss:$16 sps:$4 sm:$0xff]  }
 0x124   :  { %3610 = vmatpush1.bf16.msra.mxu0 %v5355_v1  ;;  %3782 = vmatpush1.bf16.msra.mxu1 %v5358_v2  ;;  %v5445_v1 = vld [vmem:[#allocation8 + $0x4a0] ss:$16 sps:$4 sm:$0xff]   ;;  %v5448_v2 = vld [vmem:[#allocation8 + $0x4a8] ss:$16 sps:$4 sm:$0xff]  }
 0x125   :  { %3611 = vmatprep.subr.bf16.mxu0 %v5363_v3  ;;  %3783 = vmatprep.subr.bf16.mxu1 %v5366_v4  ;;  %v5453_v3 = vld [vmem:[#allocation8 + $0x4c4] ss:$16 sps:$4 sm:$0xff]   ;;  %v5456_v4 = vld [vmem:[#allocation8 + $0x4cc] ss:$16 sps:$4 sm:$0xff]  }
 0x128   :  { %3612 = vmatpush1.bf16.msra.mxu0 %v5361_v5  ;;  %3784 = vmatpush1.bf16.msra.mxu1 %v5364_v6  ;;  %v5451_v5 = vld [vmem:[#allocation8 + $0x4c0] ss:$16 sps:$4 sm:$0xff]   ;;  %v5454_v6 = vld [vmem:[#allocation8 + $0x4c8] ss:$16 sps:$4 sm:$0xff]  }
 0x129   :  { %3613 = vmatprep.subr.bf16.mxu0 %v5369_v7  ;;  %3785 = vmatprep.subr.bf16.mxu1 %v5372_v8  ;;  %v5459_v7 = vld [vmem:[#allocation8 + $0x4e4] ss:$16 sps:$4 sm:$0xff]   ;;  %v5462_v8 = vld [vmem:[#allocation8 + $0x4ec] ss:$16 sps:$4 sm:$0xff]  }
 0x12c   :  { %3614 = vmatpush1.bf16.msra.mxu0 %v5367_v9  ;;  %3786 = vmatpush1.bf16.msra.mxu1 %v5370_v10  ;;  %v5457_v9 = vld [vmem:[#allocation8 + $0x4e0] ss:$16 sps:$4 sm:$0xff]   ;;  %v5460_v10 = vld [vmem:[#allocation8 + $0x4e8] ss:$16 sps:$4 sm:$0xff]  }
 0x12d   :  { %3615 = vmatprep.subr.bf16.mxu0 %v5375_v11  ;;  %3787 = vmatprep.subr.bf16.mxu1 %v5378_v12  ;;  %v5465_v11 = vld [vmem:[#allocation8 + $0x504] ss:$16 sps:$4 sm:$0xff]   ;;  %v5468_v12 = vld [vmem:[#allocation8 + $0x50c] ss:$16 sps:$4 sm:$0xff]  }
 0x130   :  { %3616 = vmatpush1.bf16.msra.mxu0 %v5373_v13  ;;  %3788 = vmatpush1.bf16.msra.mxu1 %v5376_v14  ;;  %v5463_v13 = vld [vmem:[#allocation8 + $0x500] ss:$16 sps:$4 sm:$0xff]   ;;  %v5466_v14 = vld [vmem:[#allocation8 + $0x508] ss:$16 sps:$4 sm:$0xff]  }
 0x131   :  { %3617 = vmatprep.subr.bf16.mxu0 %v5381_v15  ;;  %3789 = vmatprep.subr.bf16.mxu1 %v5384_v16  ;;  %v5471_v15 = vld [vmem:[#allocation8 + $0x524] ss:$16 sps:$4 sm:$0xff]   ;;  %v5474_v16 = vld [vmem:[#allocation8 + $0x52c] ss:$16 sps:$4 sm:$0xff]  }
 0x134   :  { %3618 = vmatpush1.bf16.msra.mxu0 %v5379_v17  ;;  %3790 = vmatpush1.bf16.msra.mxu1 %v5382_v18  ;;  %v5469_v17 = vld [vmem:[#allocation8 + $0x520] ss:$16 sps:$4 sm:$0xff]   ;;  %v5472_v18 = vld [vmem:[#allocation8 + $0x528] ss:$16 sps:$4 sm:$0xff]  }
 0x135   :  { %3619 = vmatprep.subr.bf16.mxu0 %v5387_v19  ;;  %3791 = vmatprep.subr.bf16.mxu1 %v5390_v20  ;;  %v5477_v19 = vld [vmem:[#allocation8 + $0x544] ss:$16 sps:$4 sm:$0xff]   ;;  %v5480_v20 = vld [vmem:[#allocation8 + $0x54c] ss:$16 sps:$4 sm:$0xff]  }
 0x138   :  { %3620 = vmatpush1.bf16.msra.mxu0 %v5385_v21  ;;  %3792 = vmatpush1.bf16.msra.mxu1 %v5388_v22  ;;  %v5475_v21 = vld [vmem:[#allocation8 + $0x540] ss:$16 sps:$4 sm:$0xff]   ;;  %v5478_v22 = vld [vmem:[#allocation8 + $0x548] ss:$16 sps:$4 sm:$0xff]  }
 0x139   :  { %3621 = vmatprep.subr.bf16.mxu0 %v5393_v23  ;;  %3793 = vmatprep.subr.bf16.mxu1 %v5396_v24  ;;  %v5483_v23 = vld [vmem:[#allocation8 + $0x564] ss:$16 sps:$4 sm:$0xff]   ;;  %v5486_v24 = vld [vmem:[#allocation8 + $0x56c] ss:$16 sps:$4 sm:$0xff]  }
 0x13c   :  { %3622 = vmatpush1.bf16.msra.mxu0 %v5391_v25  ;;  %3794 = vmatpush1.bf16.msra.mxu1 %v5394_v26  ;;  %v5481_v25 = vld [vmem:[#allocation8 + $0x560] ss:$16 sps:$4 sm:$0xff]   ;;  %v5484_v26 = vld [vmem:[#allocation8 + $0x568] ss:$16 sps:$4 sm:$0xff]  }
 0x13d   :  { %3623 = vmatprep.subr.bf16.mxu0 %v5399_v27  ;;  %3795 = vmatprep.subr.bf16.mxu1 %v5402_v28  ;;  %v5489_v27 = vld [vmem:[#allocation8 + $0x584] ss:$16 sps:$4 sm:$0xff]   ;;  %v5492_v28 = vld [vmem:[#allocation8 + $0x58c] ss:$16 sps:$4 sm:$0xff]  }
 0x140   :  { %3624 = vmatpush1.bf16.msra.mxu0 %v5397_v29  ;;  %3796 = vmatpush1.bf16.msra.mxu1 %v5400_v30  ;;  %v5487_v29 = vld [vmem:[#allocation8 + $0x580] ss:$16 sps:$4 sm:$0xff]   ;;  %v5490_v30 = vld [vmem:[#allocation8 + $0x588] ss:$16 sps:$4 sm:$0xff]  }
 0x141   :  { %3625 = vmatprep.subr.bf16.mxu0 %v5405_v31  ;;  %3797 = vmatprep.subr.bf16.mxu1 %v5408_v32  ;;  %v5495_v31 = vld [vmem:[#allocation8 + $0x5a4] ss:$16 sps:$4 sm:$0xff]   ;;  %v5498_v32 = vld [vmem:[#allocation8 + $0x5ac] ss:$16 sps:$4 sm:$0xff]  }
 0x144   :  { %3626 = vmatpush1.bf16.msra.mxu0 %v5403_v33  ;;  %3798 = vmatpush1.bf16.msra.mxu1 %v5406_v34  ;;  %v5493_v33 = vld [vmem:[#allocation8 + $0x5a0] ss:$16 sps:$4 sm:$0xff]   ;;  %v5496_v34 = vld [vmem:[#allocation8 + $0x5a8] ss:$16 sps:$4 sm:$0xff]  }
 0x145   :  { %3627 = vmatprep.subr.bf16.mxu0 %v5411_v35  ;;  %3799 = vmatprep.subr.bf16.mxu1 %v5414_v36  ;;  %v5501_v35 = vld [vmem:[#allocation8 + $0x5c4] ss:$16 sps:$4 sm:$0xff]   ;;  %v5504_v36 = vld [vmem:[#allocation8 + $0x5cc] ss:$16 sps:$4 sm:$0xff]  }
 0x148   :  { %3628 = vmatpush1.bf16.msra.mxu0 %v5409_v37  ;;  %3800 = vmatpush1.bf16.msra.mxu1 %v5412_v38  ;;  %v5499_v37 = vld [vmem:[#allocation8 + $0x5c0] ss:$16 sps:$4 sm:$0xff]   ;;  %v5502_v38 = vld [vmem:[#allocation8 + $0x5c8] ss:$16 sps:$4 sm:$0xff]  }
 0x149   :  { %3640 = vmatprep.subr.bf16.mxu0 %v5417_v39  ;;  %3812 = vmatprep.subr.bf16.mxu1 %v5420_v40  ;;  %v5507_v39 = vld [vmem:[#allocation8 + $0x5e4] ss:$16 sps:$4 sm:$0xff]   ;;  %v5510_v40 = vld [vmem:[#allocation8 + $0x5ec] ss:$16 sps:$4 sm:$0xff]  }
 0x14b   :  { %3630 = vmatmul.mubr.bf16.vlgmr.msra.gmra.mrb[32].mxu0 %v4290_v44  ;;  %3802 = vmatmul.mubr.bf16.vlgmr.msra.gmra.mrb[32].mxu1 %v4290_v44  ;;  %v5508_v44 = vld [vmem:[#allocation8 + $0x5e8] ss:$16 sps:$4 sm:$0xff]  }
 0x14c   :  { %3641 = vmatpush1.bf16.msra.mxu0 %v5415_v41  ;;  %3813 = vmatpush1.bf16.msra.mxu1 %v5418_v47  ;;  %v5505_v41 = vld [vmem:[#allocation8 + $0x5e0] ss:$16 sps:$4 sm:$0xff]   ;;  %v5513_v47 = vld [vmem:[#allocation8 + $0x604] ss:$16 sps:$4 sm:$0xff]  }
 0x14d   :  { %3642 = vmatprep.subr.bf16.mxu0 %v5423_v48  ;;  %3814 = vmatprep.subr.bf16.mxu1 %v5426_v49  ;;  %v5516_v48 = vld [vmem:[#allocation8 + $0x60c] ss:$16 sps:$4 sm:$0xff]   ;;  %v4292_v49 = vcombine.low %v5884_v45, %v5886_v46  ;;  %v5517_v45 = vld [vmem:[#allocation8 + $0x620] ss:$16 sps:$4 sm:$0xff]   ;;  %v5520_v46 = vld [vmem:[#allocation8 + $0x628] ss:$16 sps:$4 sm:$0xff]  }
 0x14e   :  { %3672 = vmatprep.mubr.bf16.mxu0 %v4293_v50  ;;  %3844 = vmatprep.mubr.bf16.mxu1 %v4293_v50  ;;  %v5892_v50 = vld [vmem:[#allocation5 + $0x18] sm:$0xff] }
 0x150   :  { %3643 = vmatpush1.bf16.msra.mxu0 %v5421_v51  ;;  %3815 = vmatpush1.bf16.msra.mxu1 %v5424_v42  ;;  %v5894_v51 = vld [vmem:[#allocation5 + $0x38] sm:$0xff]  ;;  %v5511_v42 = vld [vmem:[#allocation8 + $0x600] ss:$16 sps:$4 sm:$0xff]  }
 0x151   :  { %3644 = vmatprep.subr.bf16.mxu0 %v5429_v43  ;;  %3816 = vmatprep.subr.bf16.mxu1 %v5432_v52  ;;  %v5514_v43 = vld [vmem:[#allocation8 + $0x608] ss:$16 sps:$4 sm:$0xff]   ;;  %v5519_v52 = vld [vmem:[#allocation8 + $0x624] ss:$16 sps:$4 sm:$0xff]  }
 0x154   :  { %3645 = vmatpush1.bf16.msra.mxu0 %v5427_v53  ;;  %3817 = vmatpush1.bf16.msra.mxu1 %v5430_v54  ;;  %v5522_v53 = vld [vmem:[#allocation8 + $0x62c] ss:$16 sps:$4 sm:$0xff]   ;;  %v4295_v54 = vcombine.high %v5892_v50, %v5894_v51 }
 0x155   :  { %3646 = vmatprep.subr.bf16.mxu0 %v5435_v55  ;;  %3818 = vmatprep.subr.bf16.mxu1 %v5438_v56  ;;  %v5525_v55 = vld [vmem:[#allocation8 + $0x644] ss:$16 sps:$4 sm:$0xff]   ;;  %v5528_v56 = vld [vmem:[#allocation8 + $0x64c] ss:$16 sps:$4 sm:$0xff]  }
 0x158   :  { %3647 = vmatpush1.bf16.msra.mxu0 %v5433_v57  ;;  %3819 = vmatpush1.bf16.msra.mxu1 %v5436_v58  ;;  %v258_v57 = vlaneseq  ;;  %v5523_v58 = vld [vmem:[#allocation8 + $0x640] ss:$16 sps:$4 sm:$0xff]  }
 0x159   :  { %3648 = vmatprep.subr.bf16.mxu0 %v5441_v59  ;;  %3820 = vmatprep.subr.bf16.mxu1 %v5444_v60  ;;  %v5526_v59 = vld [vmem:[#allocation8 + $0x648] ss:$16 sps:$4 sm:$0xff]   ;;  %v5531_v60 = vld [vmem:[#allocation8 + $0x664] ss:$16 sps:$4 sm:$0xff]  }
 0x15c   :  { %3649 = vmatpush1.bf16.msra.mxu0 %v5439_v61  ;;  %3821 = vmatpush1.bf16.msra.mxu1 %v5442_v62  ;;  %v5534_v61 = vld [vmem:[#allocation8 + $0x66c] ss:$16 sps:$4 sm:$0xff]   ;;  %v5898_v62 = vshrl.u32 %v258_v57, 7 }
 0x15d   :  { %3650 = vmatprep.subr.bf16.mxu0 %v5447_v63  ;;  %3822 = vmatprep.subr.bf16.mxu1 %v5450_v0  ;;  %v5529_v63 = vld [vmem:[#allocation8 + $0x660] ss:$16 sps:$4 sm:$0xff]   ;;  %v5532_v0 = vld [vmem:[#allocation8 + $0x668] ss:$16 sps:$4 sm:$0xff]  }
 0x160   :  { %3651 = vmatpush1.bf16.msra.mxu0 %v5445_v1  ;;  %3823 = vmatpush1.bf16.msra.mxu1 %v5448_v2  ;;  %v5537_v1 = vld [vmem:[#allocation8 + $0x684] ss:$16 sps:$4 sm:$0xff]   ;;  %v5540_v2 = vld [vmem:[#allocation8 + $0x68c] ss:$16 sps:$4 sm:$0xff]  }
 0x161   :  { %3652 = vmatprep.subr.bf16.mxu0 %v5453_v3  ;;  %3824 = vmatprep.subr.bf16.mxu1 %v5456_v4  ;;  %v6404_v3 = vsub.s32 0, %v5898_v62  ;;  %v6403_v4 = vsub.s32 2, %v5898_v62 }
 0x164   :  { %3653 = vmatpush1.bf16.msra.mxu0 %v5451_v5  ;;  %3825 = vmatpush1.bf16.msra.mxu1 %v5454_v6  ;;  %v6402_v5 = vsub.s32 1, %v5898_v62  ;;  %v5535_v6 = vld [vmem:[#allocation8 + $0x680] ss:$16 sps:$4 sm:$0xff]  }
 0x165   :  { %3654 = vmatprep.subr.bf16.mxu0 %v5459_v7  ;;  %3826 = vmatprep.subr.bf16.mxu1 %v5462_v8  ;;  %v5538_v7 = vld [vmem:[#allocation8 + $0x688] ss:$16 sps:$4 sm:$0xff]   ;;  %v256_v8 = vld [vmem:[%s6398_s5] sm:$0xf] }
 0x168   :  { %3655 = vmatpush1.bf16.msra.mxu0 %v5457_v9  ;;  %3827 = vmatpush1.bf16.msra.mxu1 %v5460_v10  ;;  %v5543_v9 = vld [vmem:[#allocation8 + $0x6a4] ss:$16 sps:$4 sm:$0xff]   ;;  %v5546_v10 = vld [vmem:[#allocation8 + $0x6ac] ss:$16 sps:$4 sm:$0xff]  }
 0x169   :  { %3656 = vmatprep.subr.bf16.mxu0 %v5465_v11  ;;  %3828 = vmatprep.subr.bf16.mxu1 %v5468_v12  ;;  %v6401_v11 = vsub.s32 3, %v5898_v62  ;;  %v5909_v12 = vrot.slane %v256_v8, %v6404_v3 }
 0x16c   :  { %3657 = vmatpush1.bf16.msra.mxu0 %v5463_v13  ;;  %3829 = vmatpush1.bf16.msra.mxu1 %v5466_v14  ;;  %v5913_v13 = vrot.slane %v256_v8, %v6403_v4  ;;  %v5917_v14 = vrot.slane %v256_v8, %v6402_v5  ;;  %v5606_v5 = vld [vmem:[#allocation8 + $0x7ec] ss:$16 sps:$4 sm:$0xff]  }
 0x16d   :  { %3658 = vmatprep.subr.bf16.mxu0 %v5471_v15  ;;  %3830 = vmatprep.subr.bf16.mxu1 %v5474_v16  ;;  %v5541_v15 = vld [vmem:[#allocation8 + $0x6a0] ss:$16 sps:$4 sm:$0xff]   ;;  %v5544_v16 = vld [vmem:[#allocation8 + $0x6a8] ss:$16 sps:$4 sm:$0xff]  }
 0x170   :  { %3659 = vmatpush1.bf16.msra.mxu0 %v5469_v17  ;;  %3831 = vmatpush1.bf16.msra.mxu1 %v5472_v18  ;;  %v5549_v17 = vld [vmem:[#allocation8 + $0x6c4] ss:$16 sps:$4 sm:$0xff]  }
 0x171   :  { %3660 = vmatprep.subr.bf16.mxu0 %v5477_v19  ;;  %3832 = vmatprep.subr.bf16.mxu1 %v5480_v20  ;;  %v5921_v20 = vrot.slane %v256_v8, %v6401_v11 }
 0x174   :  { %3661 = vmatpush1.bf16.msra.mxu0 %v5475_v21  ;;  %3833 = vmatpush1.bf16.msra.mxu1 %v5478_v22  ;;  %v5552_v21 = vld [vmem:[#allocation8 + $0x6cc] ss:$16 sps:$4 sm:$0xff]  }
 0x175   :  { %3662 = vmatprep.subr.bf16.mxu0 %v5483_v23  ;;  %3834 = vmatprep.subr.bf16.mxu1 %v5486_v24 }
 0x178   :  { %3663 = vmatpush1.bf16.msra.mxu0 %v5481_v25  ;;  %3835 = vmatpush1.bf16.msra.mxu1 %v5484_v26 }
 0x179   :  { %3664 = vmatprep.subr.bf16.mxu0 %v5489_v27  ;;  %3836 = vmatprep.subr.bf16.mxu1 %v5492_v28 }
 0x17c   :  { %3665 = vmatpush1.bf16.msra.mxu0 %v5487_v29  ;;  %3837 = vmatpush1.bf16.msra.mxu1 %v5490_v30  ;;  %v5547_v29 = vld [vmem:[#allocation8 + $0x6c0] ss:$16 sps:$4 sm:$0xff]   ;;  %v5550_v30 = vld [vmem:[#allocation8 + $0x6c8] ss:$16 sps:$4 sm:$0xff]  }
 0x17d   :  { %3666 = vmatprep.subr.bf16.mxu0 %v5495_v31  ;;  %3838 = vmatprep.subr.bf16.mxu1 %v5498_v32 }
 0x180   :  { %3667 = vmatpush1.bf16.msra.mxu0 %v5493_v33  ;;  %3839 = vmatpush1.bf16.msra.mxu1 %v5496_v34 }
 0x181   :  { %3668 = vmatprep.subr.bf16.mxu0 %v5501_v35  ;;  %3840 = vmatprep.subr.bf16.mxu1 %v5504_v36  ;;  %v5555_v35 = vld [vmem:[#allocation8 + $0x6e4] ss:$16 sps:$4 sm:$0xff]   ;;  %v5558_v36 = vld [vmem:[#allocation8 + $0x6ec] ss:$16 sps:$4 sm:$0xff]  }
 0x184   :  { %3669 = vmatpush1.bf16.msra.mxu0 %v5499_v37  ;;  %3841 = vmatpush1.bf16.msra.mxu1 %v5502_v38 }
 0x185   :  { %3670 = vmatprep.subr.bf16.mxu0 %v5507_v39  ;;  %3842 = vmatprep.subr.bf16.mxu1 %v5510_v40 }
 0x188   :  { %3671 = vmatpush1.bf16.msra.mxu0 %v5505_v41  ;;  %3843 = vmatpush1.bf16.msra.mxu1 %v5508_v44 }
 0x189   :  { %3683 = vmatprep.subr.bf16.mxu0 %v5513_v47  ;;  %3855 = vmatprep.subr.bf16.mxu1 %v5516_v48  ;;  %v5553_v47 = vld [vmem:[#allocation8 + $0x6e0] ss:$16 sps:$4 sm:$0xff]   ;;  %v5556_v48 = vld [vmem:[#allocation8 + $0x6e8] ss:$16 sps:$4 sm:$0xff]  }
 0x18b   :  { %3673 = vmatmul.mubr.bf16.vlgmr.msra.gmra.mrb[32].mxu0 %v4292_v49  ;;  %3845 = vmatmul.mubr.bf16.vlgmr.msra.gmra.mrb[32].mxu1 %v4292_v49 }
 0x18c   :  { %3684 = vmatpush1.bf16.msra.mxu0 %v5511_v42  ;;  %3856 = vmatpush1.bf16.msra.mxu1 %v5514_v43  ;;  %v5561_v43 = vld [vmem:[#allocation8 + $0x704] ss:$16 sps:$4 sm:$0xff]  }
 0x18d   :  { %3685 = vmatprep.subr.bf16.mxu0 %v5519_v52  ;;  %3857 = vmatprep.subr.bf16.mxu1 %v5522_v53 }
 0x18e   :  { %3715 = vmatprep.mubr.bf16.mxu0 %v4295_v54  ;;  %3887 = vmatprep.mubr.bf16.mxu1 %v4295_v54 }
 0x190   :  { %3686 = vmatpush1.bf16.msra.mxu0 %v5517_v45  ;;  %3858 = vmatpush1.bf16.msra.mxu1 %v5520_v46  ;;  %v5564_v46 = vld [vmem:[#allocation8 + $0x70c] ss:$16 sps:$4 sm:$0xff]  }
 0x191   :  { %3687 = vmatprep.subr.bf16.mxu0 %v5525_v55  ;;  %3859 = vmatprep.subr.bf16.mxu1 %v5528_v56 }
 0x194   :  { %3688 = vmatpush1.bf16.msra.mxu0 %v5523_v58  ;;  %3860 = vmatpush1.bf16.msra.mxu1 %v5526_v59 }
 0x195   :  { %3689 = vmatprep.subr.bf16.mxu0 %v5531_v60  ;;  %3861 = vmatprep.subr.bf16.mxu1 %v5534_v61 }
 0x198   :  { %3690 = vmatpush1.bf16.msra.mxu0 %v5529_v63  ;;  %3862 = vmatpush1.bf16.msra.mxu1 %v5532_v0 }
 0x199   :  { %3691 = vmatprep.subr.bf16.mxu0 %v5537_v1  ;;  %3863 = vmatprep.subr.bf16.mxu1 %v5540_v2  ;;  %v5559_v2 = vld [vmem:[#allocation8 + $0x700] ss:$16 sps:$4 sm:$0xff]  }
 0x19c   :  { %3692 = vmatpush1.bf16.msra.mxu0 %v5535_v6  ;;  %3864 = vmatpush1.bf16.msra.mxu1 %v5538_v7  ;;  %v5562_v6 = vld [vmem:[#allocation8 + $0x708] ss:$16 sps:$4 sm:$0xff]  }
 0x19d   :  { %3693 = vmatprep.subr.bf16.mxu0 %v5543_v9  ;;  %3865 = vmatprep.subr.bf16.mxu1 %v5546_v10 }
 0x19e   :  { %v1225_v18 = vpop.f32.mrb[0].mxu0  ;;  %v1451_v19 = vpop.f32.mrb[0].mxu1 }
 0x19f   :  { %v5924_v22 = vadd.f32 %v1225_v18, %v5909_v12  ;;  %v1227_v23 = vpop.f32.mrb[1].mxu0  ;;  %v1453_v24 = vpop.f32.mrb[1].mxu1  ;;  %v5927_v25 = vadd.f32 %v1451_v19, %v5913_v13 }
 0x1a0   :  { %v5930_v26 = vadd.f32 %v1227_v23, %v5917_v14  ;;  %v1229_v27 = vpop.f32.mrb[2].mxu0  ;;  %v1455_v28 = vpop.f32.mrb[2].mxu1  ;;  %3694 = vmatpush1.bf16.msra.mxu0 %v5541_v15  ;;  %3866 = vmatpush1.bf16.msra.mxu1 %v5544_v16  ;;  %v5940_v38 = vadd.f32 %v1453_v24, %v5921_v20  ;;  %v5567_v16 = vld [vmem:[#allocation8 + $0x724] ss:$16 sps:$4 sm:$0xff]  }
 0x1a1   :  { %v1530_v31 = vmul.f32 %v5924_v22, %v5924_v22  ;;  %v5935_v32 = vadd.f32 %v1229_v27, %v5909_v12  ;;  %v1231_v33 = vpop.f32.mrb[3].mxu0  ;;  %v1457_v34 = vpop.f32.mrb[3].mxu1  ;;  %3695 = vmatprep.subr.bf16.mxu0 %v5549_v17  ;;  %3867 = vmatprep.subr.bf16.mxu1 %v5552_v21  ;;  %v1532_v41 = vmul.f32 %v5927_v25, %v5927_v25  ;;  %v5570_v17 = vld [vmem:[#allocation8 + $0x72c] ss:$16 sps:$4 sm:$0xff]  }
 0x1a2   :  { %v1531_v37 = vmul.f32 %v5930_v26, %v5930_v26  ;;  %v5943_v39 = vadd.f32 %v1231_v33, %v5917_v14  ;;  %v5952_v42 = vadd.f32 %v1455_v28, %v5913_v13  ;;  %v1533_v54 = vmul.f32 %v5940_v38, %v5940_v38 }
 0x1a3   :  { %v1534_v40 = vmul.f32 %v5935_v32, %v5935_v32  ;;  %v5957_v56 = vadd.f32 %v1457_v34, %v5921_v20 }
 0x1a4   :  { %v1535_v44 = vmul.f32 %v5943_v39, %v5943_v39  ;;  %3696 = vmatpush1.bf16.msra.mxu0 %v5547_v29  ;;  %3868 = vmatpush1.bf16.msra.mxu1 %v5550_v30  ;;  %v1594_v49 = vadd.f32 %v1531_v37, %v1530_v31  ;;  %v1536_v7 = vmul.f32 %v5952_v42, %v5952_v42  ;;  %v5565_v30 = vld [vmem:[#allocation8 + $0x720] ss:$16 sps:$4 sm:$0xff]   ;;  %v5568_v31 = vld [vmem:[#allocation8 + $0x728] ss:$16 sps:$4 sm:$0xff]  }
 0x1a5   :  { %3697 = vmatprep.subr.bf16.mxu0 %v5555_v35  ;;  %3869 = vmatprep.subr.bf16.mxu1 %v5558_v36  ;;  %v1537_v23 = vmul.f32 %v5957_v56, %v5957_v56  ;;  %v5573_v36 = vld [vmem:[#allocation8 + $0x744] ss:$16 sps:$4 sm:$0xff]  }
 0x1a6   :  { %v1235_v52 = vpop.f32.mrb[4].mxu0  ;;  %v1461_v53 = vpop.f32.mrb[4].mxu1  ;;  %v1595_v45 = vadd.f32 %v1594_v49, %v1532_v41  ;;  %v1599_v55 = vadd.f32 %v1535_v44, %v1534_v40 }
 0x1a7   :  { %v5960_v57 = vadd.f32 %v1235_v52, %v5909_v12  ;;  %v1237_v58 = vpop.f32.mrb[5].mxu0  ;;  %v1463_v59 = vpop.f32.mrb[5].mxu1  ;;  %v5963_v60 = vadd.f32 %v1461_v53, %v5913_v13  ;;  %v5576_v53 = vld [vmem:[#allocation8 + $0x74c] ss:$16 sps:$4 sm:$0xff]  }
 0x1a8   :  { %v5966_v61 = vadd.f32 %v1237_v58, %v5917_v14  ;;  %v1239_v63 = vpop.f32.mrb[6].mxu0  ;;  %v1465_v0 = vpop.f32.mrb[6].mxu1  ;;  %3698 = vmatpush1.bf16.msra.mxu0 %v5553_v47  ;;  %3870 = vmatpush1.bf16.msra.mxu1 %v5556_v48  ;;  %v1596_v1 = vadd.f32 %v1595_v45, %v1533_v54  ;;  %v5978_v19 = vadd.f32 %v1463_v59, %v5921_v20  ;;  %v5571_v59 = vld [vmem:[#allocation8 + $0x740] ss:$16 sps:$4 sm:$0xff]  }
 0x1a9   :  { %v1538_v8 = vmul.f32 %v5960_v57, %v5960_v57  ;;  %v5973_v9 = vadd.f32 %v1239_v63, %v5909_v12  ;;  %v1241_v10 = vpop.f32.mrb[7].mxu0  ;;  %v1467_v15 = vpop.f32.mrb[7].mxu1  ;;  %3699 = vmatprep.subr.bf16.mxu0 %v5561_v43  ;;  %3871 = vmatprep.subr.bf16.mxu1 %v5564_v46  ;;  %v1600_v27 = vadd.f32 %v1599_v55, %v1536_v7  ;;  %v5574_v63 = vld [vmem:[#allocation8 + $0x748] ss:$16 sps:$4 sm:$0xff]  }
 0x1aa   :  { %v1539_v18 = vmul.f32 %v5966_v61, %v5966_v61  ;;  %v5981_v21 = vadd.f32 %v1241_v10, %v5917_v14  ;;  %1597 = vadd.xlane.f32.xlu0 %v1596_v1  ;;  %v1540_v28 = vmul.f32 %v5963_v60, %v5963_v60  ;;  %v5992_v34 = vadd.f32 %v1465_v0, %v5913_v13  ;;  %v5582_v10 = vld [vmem:[#allocation8 + $0x76c] ss:$16 sps:$4 sm:$0xff]  }
 0x1ab   :  { %v1542_v24 = vmul.f32 %v5973_v9, %v5973_v9  ;;  %v1601_v35 = vadd.f32 %v1600_v27, %v1537_v23  ;;  %v1541_v41 = vmul.f32 %v5978_v19, %v5978_v19  ;;  %v5997_v48 = vadd.f32 %v1467_v15, %v5921_v20 }
 0x1ac   :  { %v1543_v29 = vmul.f32 %v5981_v21, %v5981_v21  ;;  %3700 = vmatpush1.bf16.msra.mxu0 %v5559_v2  ;;  %3872 = vmatpush1.bf16.msra.mxu1 %v5562_v6  ;;  %v1604_v33 = vadd.f32 %v1539_v18, %v1538_v8  ;;  %v1544_v0 = vmul.f32 %v5992_v34, %v5992_v34  ;;  %v5579_v8 = vld [vmem:[#allocation8 + $0x764] ss:$16 sps:$4 sm:$0xff]  }
 0x1ad   :  { %3701 = vmatprep.subr.bf16.mxu0 %v5567_v16  ;;  %3873 = vmatprep.subr.bf16.mxu1 %v5570_v17  ;;  %v1545_v18 = vmul.f32 %v5997_v48, %v5997_v48 }
 0x1ae   :  { %v1245_v37 = vpop.f32.mrb[8].mxu0  ;;  %v1471_v40 = vpop.f32.mrb[8].mxu1  ;;  %v1605_v44 = vadd.f32 %v1604_v33, %v1540_v28  ;;  %v1609_v47 = vadd.f32 %v1543_v29, %v1542_v24  ;;  %1602 = vadd.xlane.f32.xlu0 %v1601_v35 }
 0x1af   :  { %v6000_v49 = vadd.f32 %v1245_v37, %v5909_v12  ;;  %v1247_v43 = vpop.f32.mrb[9].mxu0  ;;  %v1473_v52 = vpop.f32.mrb[9].mxu1  ;;  %v6003_v54 = vadd.f32 %v1471_v40, %v5913_v13 }
 0x1b0   :  { %v6006_v45 = vadd.f32 %v1247_v43, %v5917_v14  ;;  %v1249_v46 = vpop.f32.mrb[10].mxu0  ;;  %v1475_v55 = vpop.f32.mrb[10].mxu1  ;;  %3702 = vmatpush1.bf16.msra.mxu0 %v5565_v30  ;;  %3874 = vmatpush1.bf16.msra.mxu1 %v5568_v31  ;;  %v1606_v58 = vadd.f32 %v1605_v44, %v1541_v41  ;;  %v6018_v16 = vadd.f32 %v1473_v52, %v5921_v20  ;;  %v5577_v30 = vld [vmem:[#allocation8 + $0x760] ss:$16 sps:$4 sm:$0xff]   ;;  %v5580_v31 = vld [vmem:[#allocation8 + $0x768] ss:$16 sps:$4 sm:$0xff]  }
 0x1b1   :  { %v1546_v1 = vmul.f32 %v6000_v49, %v6000_v49  ;;  %v6013_v2 = vadd.f32 %v1249_v46, %v5909_v12  ;;  %v1251_v6 = vpop.f32.mrb[11].mxu0  ;;  %v1477_v7 = vpop.f32.mrb[11].mxu1  ;;  %3703 = vmatprep.subr.bf16.mxu0 %v5573_v36  ;;  %3875 = vmatprep.subr.bf16.mxu1 %v5576_v53  ;;  %v1610_v24 = vadd.f32 %v1609_v47, %v1544_v0  ;;  %v5585_v36 = vld [vmem:[#allocation8 + $0x784] ss:$16 sps:$4 sm:$0xff]  }
 0x1b2   :  { %v1547_v15 = vmul.f32 %v6006_v45, %v6006_v45  ;;  %v6021_v17 = vadd.f32 %v1251_v6, %v5917_v14  ;;  %1607 = vadd.xlane.f32.xlu1 %v1606_v58  ;;  %v1548_v27 = vmul.f32 %v6003_v54, %v6003_v54  ;;  %v6032_v33 = vadd.f32 %v1475_v55, %v5913_v13  ;;  %v5588_v55 = vld [vmem:[#allocation8 + $0x78c] ss:$16 sps:$4 sm:$0xff]   ;;  %v5583_v6 = vld [vmem:[#allocation8 + $0x780] ss:$16 sps:$4 sm:$0xff]  }
 0x1b3   :  { %v1550_v23 = vmul.f32 %v6013_v2, %v6013_v2  ;;  %v1611_v35 = vadd.f32 %v1610_v24, %v1545_v18  ;;  %v1549_v37 = vmul.f32 %v6018_v16, %v6018_v16  ;;  %v6037_v43 = vadd.f32 %v1477_v7, %v5921_v20  ;;  %v5586_v7 = vld [vmem:[#allocation8 + $0x788] ss:$16 sps:$4 sm:$0xff]   ;;  %v5591_v24 = vld [vmem:[#allocation8 + $0x7a4] ss:$16 sps:$4 sm:$0xff]  }
 0x1b4   :  { %v1614_v28 = vadd.f32 %v1547_v15, %v1546_v1  ;;  %v1551_v29 = vmul.f32 %v6021_v17, %v6021_v17  ;;  %3704 = vmatpush1.bf16.msra.mxu0 %v5571_v59  ;;  %3876 = vmatpush1.bf16.msra.mxu1 %v5574_v63 }
 0x1b5   :  { %3705 = vmatprep.subr.bf16.mxu0 %v5579_v8  ;;  %3877 = vmatprep.subr.bf16.mxu1 %v5582_v10  ;;  %v1552_v8 = vmul.f32 %v6032_v33, %v6032_v33 }
 0x1b6   :  { %v1255_v40 = vpop.f32.mrb[12].mxu0  ;;  %v1481_v41 = vpop.f32.mrb[12].mxu1  ;;  %v1615_v44 = vadd.f32 %v1614_v28, %v1548_v27  ;;  %v1619_v47 = vadd.f32 %v1551_v29, %v1550_v23  ;;  %1612 = vadd.xlane.f32.xlu1 %v1611_v35  ;;  %v5594_v27 = vld [vmem:[#allocation8 + $0x7ac] ss:$16 sps:$4 sm:$0xff]  }
 0x1b7   :  { %v6040_v52 = vadd.f32 %v1255_v40, %v5909_v12  ;;  %v1257_v53 = vpop.f32.mrb[13].mxu0  ;;  %v1483_v46 = vpop.f32.mrb[13].mxu1  ;;  %v6043_v58 = vadd.f32 %v1481_v41, %v5913_v13 }
 0x1b8   :  { %v6046_v59 = vadd.f32 %v1257_v53, %v5917_v14  ;;  %v1259_v63 = vpop.f32.mrb[14].mxu0  ;;  %v1485_v0 = vpop.f32.mrb[14].mxu1  ;;  %3706 = vmatpush1.bf16.msra.mxu0 %v5577_v30  ;;  %3878 = vmatpush1.bf16.msra.mxu1 %v5580_v31  ;;  %v1616_v1 = vadd.f32 %v1615_v44, %v1549_v37  ;;  %v6058_v29 = vadd.f32 %v1483_v46, %v5921_v20  ;;  %v5589_v44 = vld [vmem:[#allocation8 + $0x7a0] ss:$16 sps:$4 sm:$0xff]   ;;  %v5592_v53 = vld [vmem:[#allocation8 + $0x7a8] ss:$16 sps:$4 sm:$0xff]  }
 0x1b9   :  { %v1554_v10 = vmul.f32 %v6040_v52, %v6040_v52  ;;  %v6053_v15 = vadd.f32 %v1259_v63, %v5909_v12  ;;  %v1261_v18 = vpop.f32.mrb[15].mxu0  ;;  %v1487_v23 = vpop.f32.mrb[15].mxu1  ;;  %3707 = vmatprep.subr.bf16.mxu0 %v5585_v36  ;;  %v1553_v31 = vmul.f32 %v6037_v43, %v6037_v43  ;;  %3879 = vmatprep.subr.bf16.mxu1 %v5588_v55 }
 0x1ba   :  { %v1555_v28 = vmul.f32 %v6046_v59, %v6046_v59  ;;  %v6061_v30 = vadd.f32 %v1261_v18, %v5917_v14  ;;  %1617 = vadd.xlane.f32.xlu0 %v1616_v1  ;;  %v1620_v36 = vadd.f32 %v1619_v47, %v1552_v8  ;;  %v1556_v37 = vmul.f32 %v6043_v58, %v6043_v58  ;;  %v5597_v1 = vld [vmem:[#allocation8 + $0x7c4] ss:$16 sps:$4 sm:$0xff]  }
 0x1bb   :  { %v1558_v35 = vmul.f32 %v6053_v15, %v6053_v15  ;;  %v6072_v46 = vadd.f32 %v1485_v0, %v5913_v13  ;;  %v1557_v47 = vmul.f32 %v6058_v29, %v6058_v29 }
 0x1bc   :  { %v1624_v40 = vadd.f32 %v1555_v28, %v1554_v10  ;;  %v1559_v41 = vmul.f32 %v6061_v30, %v6061_v30  ;;  %3708 = vmatpush1.bf16.msra.mxu0 %v5583_v6  ;;  %3880 = vmatpush1.bf16.msra.mxu1 %v5586_v7  ;;  %v1621_v63 = vadd.f32 %v1620_v36, %v1553_v31  ;;  %v5600_v31 = vld [vmem:[#allocation8 + $0x7cc] ss:$16 sps:$4 sm:$0xff]  }
 0x1bd   :  { %6432 = vst [vmem:[#allocation18_spill] sm:$0xff] %v6072_v46  ;;  %3709 = vmatprep.subr.bf16.mxu0 %v5591_v24  ;;  %3881 = vmatprep.subr.bf16.mxu1 %v5594_v27  ;;  %v6077_v28 = vadd.f32 %v1487_v23, %v5921_v20  ;;  %v5595_v23 = vld [vmem:[#allocation8 + $0x7c0] ss:$16 sps:$4 sm:$0xff]  }
 0x1be   :  { %v1265_v55 = vpop.f32.mrb[16].mxu0  ;;  %v1491_v8 = vpop.f32.mrb[16].mxu1  ;;  %v1625_v10 = vadd.f32 %v1624_v40, %v1556_v37  ;;  %v1629_v18 = vadd.f32 %v1559_v41, %v1558_v35  ;;  %1622 = vadd.xlane.f32.xlu1 %v1621_v63  ;;  %v5598_v37 = vld [vmem:[#allocation8 + $0x7c8] ss:$16 sps:$4 sm:$0xff]   ;;  %v1560_v40 = vmul.f32 %v6072_v46, %v6072_v46 }
 0x1bf   :  { %v6080_v6 = vadd.f32 %v1265_v55, %v5909_v12  ;;  %v1267_v0 = vpop.f32.mrb[17].mxu0  ;;  %v1493_v7 = vpop.f32.mrb[17].mxu1  ;;  %v6083_v24 = vadd.f32 %v1491_v8, %v5913_v13 }
 0x1c0   :  { %v6086_v27 = vadd.f32 %v1267_v0, %v5917_v14  ;;  %v1269_v36 = vpop.f32.mrb[18].mxu0  ;;  %v1495_v11 = vpop.f32.mrb[18].mxu1  ;;  %3710 = vmatpush1.bf16.msra.mxu0 %v5589_v44  ;;  %3882 = vmatpush1.bf16.msra.mxu1 %v5592_v53  ;;  %v1626_v35 = vadd.f32 %v1625_v10, %v1557_v47  ;;  %v5603_v0 = vld [vmem:[#allocation8 + $0x7e4] ss:$16 sps:$4 sm:$0xff]   ;;  %v6098_v53 = vadd.f32 %v1493_v7, %v5921_v20 }
 0x1c1   :  { %6433 = vst [vmem:[#allocation19_spill] sm:$0xff] %v6080_v6  ;;  %v1562_v41 = vmul.f32 %v6080_v6, %v6080_v6  ;;  %v6093_v63 = vadd.f32 %v1269_v36, %v5909_v12  ;;  %v1271_v55 = vpop.f32.mrb[19].mxu0  ;;  %v1497_v8 = vpop.f32.mrb[19].mxu1  ;;  %3711 = vmatprep.subr.bf16.mxu0 %v5597_v1  ;;  %v1561_v10 = vmul.f32 %v6077_v28, %v6077_v28  ;;  %v5604_v6 = vld [vmem:[#allocation8 + $0x7e8] ss:$16 sps:$4 sm:$0xff]  }
 0x1c2   :  { %v1563_v44 = vmul.f32 %v6086_v27, %v6086_v27  ;;  %v6101_v47 = vadd.f32 %v1271_v55, %v5917_v14  ;;  %1627 = vadd.xlane.f32.xlu0 %v1626_v35  ;;  %3883 = vmatprep.subr.bf16.mxu1 %v5600_v31  ;;  %v1630_v1 = vadd.f32 %v1629_v18, %v1560_v40  ;;  %v5601_v55 = vld [vmem:[#allocation8 + $0x7e0] ss:$16 sps:$4 sm:$0xff]  }
 0x1c3   :  { %6434 = vst [vmem:[#allocation20_spill] sm:$0xff] %v6093_v63  ;;  %v1566_v36 = vmul.f32 %v6093_v63, %v6093_v63  ;;  %v1564_v4 = vmul.f32 %v6083_v24, %v6083_v24  ;;  %v6112_v35 = vadd.f32 %v1495_v11, %v5913_v13  ;;  %v1565_v18 = vmul.f32 %v6098_v53, %v6098_v53 }
 0x1c4   :  { %v1634_v3 = vadd.f32 %v1563_v44, %v1562_v41  ;;  %v1567_v7 = vmul.f32 %v6101_v47, %v6101_v47  ;;  %3712 = vmatpush1.bf16.msra.mxu0 %v5595_v23  ;;  %3884 = vmatpush1.bf16.msra.mxu1 %v5598_v37  ;;  %v1631_v46 = vadd.f32 %v1630_v1, %v1561_v10 }
 0x1c5   :  { %6435 = vst [vmem:[#allocation21_spill] sm:$0xff] %v6112_v35  ;;  %3713 = vmatprep.subr.bf16.mxu0 %v5603_v0  ;;  %3885 = vmatprep.subr.bf16.mxu1 %v5606_v5  ;;  %v6117_v44 = vadd.f32 %v1497_v8, %v5921_v20  ;;  %v4294_v0 = vcombine.low %v5892_v50, %v5894_v51 }
 0x1c6   :  { %v1275_v31 = vpop.f32.mrb[20].mxu0  ;;  %v1501_v40 = vpop.f32.mrb[20].mxu1  ;;  %v1635_v63 = vadd.f32 %v1634_v3, %v1564_v4  ;;  %v1639_v41 = vadd.f32 %v1567_v7, %v1566_v36  ;;  %1632 = vadd.xlane.f32.xlu1 %v1631_v46  ;;  %v1568_v46 = vmul.f32 %v6112_v35, %v6112_v35 }
 0x1c7   :  { %v6120_v23 = vadd.f32 %v1275_v31, %v5909_v12  ;;  %v1277_v37 = vpop.f32.mrb[21].mxu0  ;;  %v1503_v11 = vpop.f32.mrb[21].mxu1  ;;  %v6125_v5 = vadd.f32 %v1501_v40, %v5913_v13 }
 0x1c8   :  { %v6128_v10 = vadd.f32 %v1277_v37, %v5917_v14  ;;  %v1279_v3 = vpop.f32.mrb[22].mxu0  ;;  %v1505_v4 = vpop.f32.mrb[22].mxu1  ;;  %3714 = vmatpush1.bf16.msra.mxu0 %v5601_v55  ;;  %3886 = vmatpush1.bf16.msra.mxu1 %v5604_v6  ;;  %v1636_v8 = vadd.f32 %v1635_v63, %v1565_v18  ;;  %v6140_v31 = vadd.f32 %v1503_v11, %v5921_v20 }
 0x1c9   :  { %6436 = vst [vmem:[#allocation22_spill] sm:$0xff] %v6120_v23  ;;  %6437 = vst [vmem:[#allocation23_spill] sm:$0xff] %v6125_v5  ;;  %v1570_v36 = vmul.f32 %v6120_v23, %v6120_v23  ;;  %v6135_v1 = vadd.f32 %v1279_v3, %v5909_v12  ;;  %v1281_v50 = vpop.f32.mrb[23].mxu0  ;;  %v1507_v51 = vpop.f32.mrb[23].mxu1  ;;  %v6143_v6 = vadd.f32 %v1505_v4, %v5913_v13 }
 0x1ca   :  { %v1571_v7 = vmul.f32 %v6128_v10, %v6128_v10  ;;  %v6146_v63 = vadd.f32 %v1281_v50, %v5917_v14  ;;  %1637 = vadd.xlane.f32.xlu0 %v1636_v8  ;;  %v1569_v55 = vmul.f32 %v6117_v44, %v6117_v44  ;;  %v1640_v40 = vadd.f32 %v1639_v41, %v1568_v46 }
 0x1cb   :  { %6438 = vst [vmem:[#allocation24_spill] sm:$0xff] %v6135_v1  ;;  %6439 = vst [vmem:[#allocation25_spill] sm:$0xff] %v6143_v6  ;;  %v1574_v18 = vmul.f32 %v6135_v1, %v6135_v1  ;;  %3716 = vmatmul.mubr.bf16.vlgmr.msra.gmra.mrb[32].mxu0 %v4294_v0  ;;  %3888 = vmatmul.mubr.bf16.vlgmr.msra.gmra.mrb[32].mxu1 %v4294_v0  ;;  %v1572_v37 = vmul.f32 %v6125_v5, %v6125_v5 }
 0x1cc   :  { %6440 = vst [vmem:[#allocation26_spill] sm:$0xff] %v6146_v63  ;;  %v1644_v11 = vadd.f32 %v1571_v7, %v1570_v36  ;;  %v1575_v3 = vmul.f32 %v6146_v63, %v6146_v63  ;;  %v6157_v4 = vadd.f32 %v1507_v51, %v5921_v20  ;;  %v1641_v8 = vadd.f32 %v1640_v40, %v1569_v55 }
 0x1cd   :  { %v1573_v50 = vmul.f32 %v6140_v31, %v6140_v31  ;;  %v1576_v1 = vmul.f32 %v6143_v6, %v6143_v6 }
 0x1ce   :  { %6441 = vst [vmem:[#allocation27_spill] sm:$0xff] %v6157_v4  ;;  %v1649_v23 = vadd.f32 %v1575_v3, %v1574_v18  ;;  %v1285_v0 = vpop.f32.mrb[24].mxu0  ;;  %v1511_v41 = vpop.f32.mrb[24].mxu1  ;;  %v1645_v46 = vadd.f32 %v1644_v11, %v1572_v37  ;;  %1642 = vadd.xlane.f32.xlu1 %v1641_v8  ;;  %v1577_v18 = vmul.f32 %v6157_v4, %v6157_v4 }
 0x1cf   :  { %v6164_v36 = vadd.f32 %v1285_v0, %v5909_v12  ;;  %v1287_v7 = vpop.f32.mrb[25].mxu0  ;;  %v1513_v5 = vpop.f32.mrb[25].mxu1  ;;  %v6167_v51 = vadd.f32 %v1511_v41, %v5913_v13 }
 0x1d0   :  { %v6170_v55 = vadd.f32 %v1287_v7, %v5917_v14  ;;  %v1289_v40 = vpop.f32.mrb[26].mxu0  ;;  %v1515_v63 = vpop.f32.mrb[26].mxu1  ;;  %v1646_v35 = vadd.f32 %v1645_v46, %v1573_v50  ;;  %v1650_v6 = vadd.f32 %v1649_v23, %v1576_v1  ;;  %v6182_v41 = vadd.f32 %v1513_v5, %v5921_v20 }
 0x1d1   :  { %6442 = vst [vmem:[#allocation28_spill] sm:$0xff] %v6164_v36  ;;  %6443 = vst [vmem:[#allocation29_spill] sm:$0xff] %v6167_v51  ;;  %v1578_v37 = vmul.f32 %v6164_v36, %v6164_v36  ;;  %v6177_v11 = vadd.f32 %v1289_v40, %v5909_v12  ;;  %v1291_v3 = vpop.f32.mrb[27].mxu0  ;;  %v1517_v8 = vpop.f32.mrb[27].mxu1  ;;  %v6185_v50 = vadd.f32 %v1515_v63, %v5913_v13 }
 0x1d2   :  { %6444 = vst [vmem:[#allocation30_spill] sm:$0xff] %v6170_v55  ;;  %v1579_v0 = vmul.f32 %v6170_v55, %v6170_v55  ;;  %6446 = vst [vmem:[#allocation32_spill] sm:$0xff] %v6182_v41  ;;  %v6188_v23 = vadd.f32 %v1291_v3, %v5917_v14  ;;  %1647 = vadd.xlane.f32.xlu0 %v1646_v35  ;;  %v1651_v46 = vadd.f32 %v1650_v6, %v1577_v18 }
 0x1d3   :  { %6445 = vst [vmem:[#allocation31_spill] sm:$0xff] %v6177_v11  ;;  %v1582_v1 = vmul.f32 %v6177_v11, %v6177_v11  ;;  %v1580_v7 = vmul.f32 %v6167_v51, %v6167_v51  ;;  %v6197_v5 = vadd.f32 %v1517_v8, %v5921_v20  ;;  %v1581_v63 = vmul.f32 %v6182_v41, %v6182_v41 }
 0x1d4   :  { %6447 = vst [vmem:[#allocation33_spill] sm:$0xff] %v6188_v23  ;;  %v1654_v40 = vadd.f32 %v1579_v0, %v1578_v37  ;;  %v1583_v36 = vmul.f32 %v6188_v23, %v6188_v23  ;;  %1652 = vadd.xlane.f32.xlu1 %v1651_v46  ;;  %v1584_v35 = vmul.f32 %v6185_v50, %v6185_v50 }
 0x1d6   :  { %v1659_v3 = vadd.f32 %v1583_v36, %v1582_v1  ;;  %v1295_v11 = vpop.f32.mrb[28].mxu0  ;;  %v1521_v6 = vpop.f32.mrb[28].mxu1  ;;  %v1655_v18 = vadd.f32 %v1654_v40, %v1580_v7  ;;  %v1585_v36 = vmul.f32 %v6197_v5, %v6197_v5 }
 0x1d7   :  { %v6204_v51 = vadd.f32 %v1295_v11, %v5909_v12  ;;  %v1297_v37 = vpop.f32.mrb[29].mxu0  ;;  %v1523_v0 = vpop.f32.mrb[29].mxu1  ;;  %v6207_v23 = vadd.f32 %v1521_v6, %v5913_v13 }
 0x1d8   :  { %v6210_v8 = vadd.f32 %v1297_v37, %v5917_v14  ;;  %v1299_v46 = vpop.f32.mrb[30].mxu0  ;;  %v1525_v41 = vpop.f32.mrb[30].mxu1  ;;  %v1656_v55 = vadd.f32 %v1655_v18, %v1581_v63  ;;  %v1660_v4 = vadd.f32 %v1659_v3, %v1584_v35  ;;  %v6222_v37 = vadd.f32 %v1523_v0, %v5921_v20 }
 0x1d9   :  { %6448 = vst [vmem:[#allocation34_spill] sm:$0xff] %v6204_v51  ;;  %6449 = vst [vmem:[#allocation35_spill] sm:$0xff] %v6207_v23  ;;  %v1586_v1 = vmul.f32 %v6204_v51, %v6204_v51  ;;  %v6217_v11 = vadd.f32 %v1299_v46, %v5909_v12  ;;  %v1301_v7 = vpop.f32.mrb[31].mxu0  ;;  %v1527_v40 = vpop.f32.mrb[31].mxu1  ;;  %v6225_v63 = vadd.f32 %v1525_v41, %v5913_v13 }
 0x1da   :  { %v1587_v6 = vmul.f32 %v6210_v8, %v6210_v8  ;;  %v6228_v35 = vadd.f32 %v1301_v7, %v5917_v14  ;;  %1657 = vadd.xlane.f32.xlu0 %v1656_v55  ;;  %v1661_v12 = vadd.f32 %v1660_v4, %v1585_v36  ;;  %v1588_v18 = vmul.f32 %v6207_v23, %v6207_v23 }
 0x1db   :  { %6450 = vst [vmem:[#allocation36_spill] sm:$0xff] %v6217_v11  ;;  %6451 = vst [vmem:[#allocation37_spill] sm:$0xff] %v6225_v63  ;;  %v1590_v3 = vmul.f32 %v6217_v11, %v6217_v11  ;;  %v6237_v0 = vadd.f32 %v1527_v40, %v5921_v20  ;;  %v1589_v13 = vmul.f32 %v6222_v37, %v6222_v37  ;;  %v3925_v20 = vld [vmem:[%s6395_s2] sm:$0xf]  ;;  %v6453_v40 = vsub.s32 0, %v5898_v62 }
 0x1dc   :  { %v1664_v46 = vadd.f32 %v1587_v6, %v1586_v1  ;;  %v1591_v51 = vmul.f32 %v6228_v35, %v6228_v35  ;;  %1662 = vadd.xlane.f32.xlu1 %v1661_v12  ;;  %v1592_v14 = vmul.f32 %v6225_v63, %v6225_v63  ;;  %v6454_v12 = vsub.s32 2, %v5898_v62 }
 0x1dd   :  { %6452 = vst [vmem:[#allocation38_spill] sm:$0xff] %v6237_v0  ;;  %v1593_v4 = vmul.f32 %v6237_v0, %v6237_v0  ;;  %v3930_v6 = vrot.slane %v3925_v20, %v6453_v40 }
 0x1de   :  { %v1669_v55 = vadd.f32 %v1591_v51, %v1590_v3  ;;  %v1665_v41 = vadd.f32 %v1664_v46, %v1588_v18  ;;  %v3938_v63 = vrot.slane %v3925_v20, %v6454_v12  ;;  %v6455_v51 = vsub.s32 1, %v5898_v62 }
 0x1e0   :  { %v1666_v36 = vadd.f32 %v1665_v41, %v1589_v13  ;;  %v1670_v1 = vadd.f32 %v1669_v55, %v1592_v14  ;;  %v3934_v3 = vrot.slane %v3925_v20, %v6455_v51  ;;  %v6456_v13 = vsub.s32 3, %v5898_v62 }
 0x1e2   :  { %1667 = vadd.xlane.f32.xlu0 %v1666_v36  ;;  %v1671_v7 = vadd.f32 %v1670_v1, %v1593_v4  ;;  %v3942_v14 = vrot.slane %v3925_v20, %v6456_v13 }
 0x1e4   :  { %1672 = vadd.xlane.f32.xlu1 %v1671_v7 }
 0x29e   :  { %v3717_v18 = vpop.f32.mrb[32].mxu0  ;;  %v3889_v46 = vpop.f32.mrb[32].mxu1 }
 0x29f   :  { %v6256_v55 = vadd.f32 %v3930_v6, %v3717_v18  ;;  %v3719_v41 = vpop.f32.mrb[33].mxu0  ;;  %v3891_v4 = vpop.f32.mrb[33].mxu1  ;;  %v6258_v36 = vadd.f32 %v3938_v63, %v3889_v46 }
 0x2a0   :  { %v6260_v1 = vadd.f32 %v3934_v3, %v3719_v41  ;;  %v3721_v7 = vpop.f32.mrb[34].mxu0  ;;  %v3893_v40 = vpop.f32.mrb[34].mxu1  ;;  %v6268_v20 = vadd.f32 %v3942_v14, %v3891_v4 }
 0x2a1   :  { %6457 = vst [vmem:[#allocation39_spill] sm:$0xff] %v6256_v55  ;;  %6458 = vst [vmem:[#allocation40_spill] sm:$0xff] %v6258_v36  ;;  %v3955_v12 = vmul.f32 %v6256_v55, %v6256_v55  ;;  %v6264_v11 = vadd.f32 %v3930_v6, %v3721_v7  ;;  %v3723_v51 = vpop.f32.mrb[35].mxu0  ;;  %v3895_v23 = vpop.f32.mrb[35].mxu1  ;;  %v6270_v18 = vadd.f32 %v3938_v63, %v3893_v40 }
 0x2a2   :  { %6459 = vst [vmem:[#allocation41_spill] sm:$0xff] %v6260_v1  ;;  %v3956_v62 = vmul.f32 %v6260_v1, %v6260_v1  ;;  %6461 = vst [vmem:[#allocation43_spill] sm:$0xff] %v6268_v20  ;;  %v6272_v46 = vadd.f32 %v3934_v3, %v3723_v51  ;;  %v3957_v41 = vmul.f32 %v6258_v36, %v6258_v36 }
 0x2a3   :  { %6460 = vst [vmem:[#allocation42_spill] sm:$0xff] %v6264_v11  ;;  %v3959_v13 = vmul.f32 %v6264_v11, %v6264_v11  ;;  %v6280_v7 = vadd.f32 %v3942_v14, %v3895_v23  ;;  %v3958_v4 = vmul.f32 %v6268_v20, %v6268_v20  ;;  %v3961_v63 = vmul.f32 %v6270_v18, %v6270_v18  ;;  %v1608_v14 = vpop.xlane.xlu1 %1607 }
 0x2a4   :  { %6462 = vst [vmem:[#allocation44_spill] sm:$0xff] %v6272_v46  ;;  %v3963_v55 = vadd.f32 %v3956_v62, %v3955_v12  ;;  %v3960_v6 = vmul.f32 %v6272_v46, %v6272_v46  ;;  %v1598_v62 = vpop.xlane.xlu0 %1597  ;;  %v1676_v20 = vadd.f32 1e-12, %v1608_v14 }
 0x2a5   :  { %v3962_v51 = vmul.f32 %v6280_v7, %v6280_v7  ;;  %v1674_v46 = vadd.f32 1e-12, %v1598_v62 }
 0x2a6   :  { %v3968_v3 = vadd.f32 %v3960_v6, %v3959_v13  ;;  %v3964_v40 = vadd.f32 %v3963_v55, %v3957_v41 }
 0x2a7   :  { %5607 = vrsqrt.f32 %v1674_v46  ;;  %v1613_v0 = vpop.xlane.xlu1 %1612 }
 0x2a8   :  { %v3965_v11 = vadd.f32 %v3964_v40, %v3958_v4  ;;  %v3969_v1 = vadd.f32 %v3968_v3, %v3961_v63  ;;  %v1603_v23 = vpop.xlane.xlu0 %1602  ;;  %v1677_v13 = vadd.f32 1e-12, %v1613_v0 }
 0x2a9   :  { %v1675_v36 = vadd.f32 1e-12, %v1603_v23 }
 0x2aa   :  { %3966 = vadd.xlane.f32.xlu0 %v3965_v11  ;;  %v3970_v12 = vadd.f32 %v3969_v1, %v3962_v51 }
 0x2ab   :  { %5609 = vrsqrt.f32 %v1675_v36  ;;  %v1623_v4 = vpop.xlane.xlu1 %1622 }
 0x2ac   :  { %3971 = vadd.xlane.f32.xlu1 %v3970_v12  ;;  %5611 = vrsqrt.f32 %v1676_v20  ;;  %v1618_v55 = vpop.xlane.xlu0 %1617  ;;  %v1679_v3 = vadd.f32 1e-12, %v1623_v4 }
 0x2ad   :  { %5613 = vrsqrt.f32 %v1677_v13  ;;  %v1678_v6 = vadd.f32 1e-12, %v1618_v55 }
 0x2af   :  { %5615 = vrsqrt.f32 %v1678_v6 }
 0x2b0   :  { %v1628_v40 = vpop.xlane.xlu0 %1627  ;;  %5617 = vrsqrt.f32 %v1679_v3 }
 0x2b1   :  { %v5608_v41 = vpop.eup %5607  ;;  %v1680_v0 = vadd.f32 1e-12, %v1628_v40 }
 0x2b2   :  { %v1707_v11 = vmul.f32 %v5608_v41, %v5930_v26  ;;  %v1709_v1 = vmul.f32 %v5608_v41, %v5940_v38  ;;  %v1706_v12 = vmul.f32 %v5608_v41, %v5924_v22  ;;  %v1708_v62 = vmul.f32 %v5608_v41, %v5927_v25  ;;  %v1633_v26 = vpop.xlane.xlu1 %1632 }
 0x2b3   :  { %5619 = vrsqrt.f32 %v1680_v0 }
 0x2b4   :  { %v4759_v46 = vpack.i.bf16 %v1709_v1, %v1707_v11  ;;  %v4871_v55 = vpack.i.bf16 %v1708_v62, %v1706_v12  ;;  %v1638_v6 = vpop.xlane.xlu0 %1637 }
 0x2b5   :  { %v5610_v63 = vpop.eup %5609 }
 0x2b6   :  { %v1711_v36 = vmul.f32 %v5610_v63, %v5943_v39  ;;  %v1713_v51 = vmul.f32 %v5610_v63, %v5957_v56  ;;  %v5612_v20 = vpop.eup %5611  ;;  %v1681_v39 = vadd.f32 1e-12, %v1633_v26  ;;  %v1710_v56 = vmul.f32 %v5610_v63, %v5935_v32  ;;  %v1643_v3 = vpop.xlane.xlu1 %1642 }
 0x2b7   :  { %v1715_v38 = vmul.f32 %v5612_v20, %v5966_v61  ;;  %v1717_v14 = vmul.f32 %v5612_v20, %v5978_v19  ;;  %v5614_v13 = vpop.eup %5613  ;;  %v1712_v25 = vmul.f32 %v5610_v63, %v5952_v42  ;;  %v1682_v61 = vadd.f32 1e-12, %v1638_v6 }
 0x2b8   :  { %v4761_v23 = vpack.i.bf16 %v1713_v51, %v1711_v36  ;;  %v1719_v11 = vmul.f32 %v5614_v13, %v5981_v21  ;;  %v1721_v22 = vmul.f32 %v5614_v13, %v5997_v48  ;;  %5621 = vrsqrt.f32 %v1681_v39  ;;  %v1648_v51 = vpop.xlane.xlu0 %1647 }
 0x2b9   :  { %v4763_v4 = vpack.i.bf16 %v1717_v14, %v1715_v38  ;;  %v5616_v41 = vpop.eup %5615  ;;  %v1714_v19 = vmul.f32 %v5612_v20, %v5960_v57  ;;  %v1716_v1 = vmul.f32 %v5612_v20, %v5963_v60  ;;  %v4873_v32 = vpack.i.bf16 %v1712_v25, %v1710_v56 }
 0x2ba   :  { %v4765_v40 = vpack.i.bf16 %v1721_v22, %v1719_v11  ;;  %v1725_v21 = vmul.f32 %v5616_v41, %v6018_v16  ;;  %v5618_v36 = vpop.eup %5617  ;;  %5623 = vrsqrt.f32 %v1682_v61  ;;  %v1683_v42 = vadd.f32 1e-12, %v1643_v3  ;;  %v1653_v26 = vpop.xlane.xlu1 %1652 }
 0x2bb   :  { %v4875_v48 = vpack.i.bf16 %v1716_v1, %v1714_v19  ;;  %v1718_v63 = vmul.f32 %v5614_v13, %v5973_v9  ;;  %v1720_v57 = vmul.f32 %v5614_v13, %v5992_v34  ;;  %v1727_v60 = vmul.f32 %v5618_v36, %v6021_v17 }
 0x2bc   :  { %v1729_v20 = vmul.f32 %v5618_v36, %v6037_v43  ;;  %5625 = vrsqrt.f32 %v1683_v42  ;;  %v1722_v16 = vmul.f32 %v5616_v41, %v6000_v49  ;;  %v1724_v62 = vmul.f32 %v5616_v41, %v6003_v54  ;;  %v1658_v39 = vpop.xlane.xlu0 %1657 }
 0x2bd   :  { %v5620_v12 = vpop.eup %5619  ;;  %v1685_v17 = vadd.f32 1e-12, %v1653_v26  ;;  %v1726_v13 = vmul.f32 %v5618_v36, %v6013_v2  ;;  %v1728_v49 = vmul.f32 %v5618_v36, %v6032_v33 }
 0x2be   :  { %v4769_v9 = vpack.i.bf16 %v1729_v20, %v1727_v60  ;;  %v1731_v38 = vmul.f32 %v5620_v12, %v6046_v59  ;;  %v1733_v34 = vmul.f32 %v5620_v12, %v6058_v29  ;;  %v4879_v43 = vpack.i.bf16 %v1724_v62, %v1722_v16  ;;  %v1663_v11 = vpop.xlane.xlu1 %1662  ;;  %v6466_v20 = vld [vmem:[#allocation21_spill] sm:$0xff]  ;;  %v6468_v16 = vld [vmem:[#allocation27_spill] sm:$0xff] }
 0x2bf   :  { %v1686_v59 = vadd.f32 1e-12, %v1658_v39  ;;  %v1730_v29 = vmul.f32 %v5620_v12, %v6040_v52  ;;  %v4881_v22 = vpack.i.bf16 %v1728_v49, %v1726_v13  ;;  %v6463_v52 = vld [vmem:[#allocation18_spill] sm:$0xff]  ;;  %v6473_v49 = vld [vmem:[#allocation24_spill] sm:$0xff] }
 0x2c0   :  { %v1668_v19 = vpop.xlane.xlu0 %1667 }
 0x2c2   :  { %v5622_v14 = vpop.eup %5621  ;;  %v1673_v36 = vpop.xlane.xlu1 %1672 }
 0x2c3   :  { %v1735_v54 = vmul.f32 %v5622_v14, %v6061_v30  ;;  %v1737_v56 = vmul.f32 %v5622_v14, %v6077_v28  ;;  %v1687_v30 = vadd.f32 1e-12, %v1663_v11  ;;  %v1734_v61 = vmul.f32 %v5622_v14, %v6053_v15 }
 0x2c4   :  { %v5624_v6 = vpop.eup %5623  ;;  %v1736_v3 = vmul.f32 %v5622_v14, %v6463_v52  ;;  %v6471_v14 = vld [vmem:[#allocation30_spill] sm:$0xff] }
 0x2c5   :  { %v4773_v2 = vpack.i.bf16 %v1737_v56, %v1735_v54  ;;  %v1739_v25 = vmul.f32 %v5624_v6, %v6086_v27  ;;  %v1741_v33 = vmul.f32 %v5624_v6, %v6098_v53  ;;  %v1688_v27 = vadd.f32 1e-12, %v1668_v19  ;;  %v6464_v53 = vld [vmem:[#allocation19_spill] sm:$0xff] }
 0x2c6   :  { %v4885_v42 = vpack.i.bf16 %v1736_v3, %v1734_v61  ;;  %v6478_v3 = vld [vmem:[#allocation31_spill] sm:$0xff] }
 0x2c7   :  { %v4775_v1 = vpack.i.bf16 %v1741_v33, %v1739_v25  ;;  %v6477_v33 = vld [vmem:[#allocation29_spill] sm:$0xff] }
 0x2d7   :  { %4760 = vxpose.xlu0.b32.start [1/16] %v4759_v46, 128  ;;  %v1723_v46 = vmul.f32 %v5616_v41, %v6006_v45  ;;  %v1684_v45 = vadd.f32 1e-12, %v1648_v51  ;;  %v5626_v41 = vpop.eup %5625 }
 0x2d9   :  { %v4767_v0 = vpack.i.bf16 %v1725_v21, %v1723_v46  ;;  %5627 = vrsqrt.f32 %v1684_v45  ;;  %v1738_v46 = vmul.f32 %v5624_v6, %v6464_v53  ;;  %v1740_v21 = vmul.f32 %v5624_v6, %v6083_v24  ;;  %v6467_v45 = vld [vmem:[#allocation26_spill] sm:$0xff]  ;;  %v6474_v6 = vld [vmem:[#allocation25_spill] sm:$0xff] }
 0x2da   :  { %5629 = vrsqrt.f32 %v1685_v17 }
 0x2db   :  { %4762 = vxpose.xlu0.b32.cont [2/16] %v4761_v23, 128  ;;  %v4877_v23 = vpack.i.bf16 %v1720_v57, %v1718_v63  ;;  %5631 = vrsqrt.f32 %v1686_v59 }
 0x2dc   :  { %5633 = vrsqrt.f32 %v1687_v30 }
 0x2dd   :  { %5635 = vrsqrt.f32 %v1688_v27  ;;  %v6479_v27 = vld [vmem:[#allocation38_spill] sm:$0xff] }
 0x2df   :  { %4872 = vxpose.xlu1.b32.start [1/16] %v4871_v55, 128  ;;  %4764 = vxpose.xlu0.b32.cont [3/16] %v4763_v4, 128  ;;  %v4771_v55 = vpack.i.bf16 %v1733_v34, %v1731_v38  ;;  %v1732_v4 = vmul.f32 %v5620_v12, %v6043_v58  ;;  %v1743_v58 = vmul.f32 %v5626_v41, %v6101_v47  ;;  %v1689_v47 = vadd.f32 1e-12, %v1673_v36 }
 0x2e0   :  { %v1744_v12 = vmul.f32 %v5626_v41, %v6466_v20 }
 0x2e1   :  { %v4883_v28 = vpack.i.bf16 %v1732_v4, %v1730_v29  ;;  %5637 = vrsqrt.f32 %v1689_v47  ;;  %v6475_v29 = vld [vmem:[#allocation33_spill] sm:$0xff] }
 0x2e3   :  { %4766 = vxpose.xlu0.b32.cont [4/16] %v4765_v40, 128  ;;  %4874 = vxpose.xlu1.b32.cont [2/16] %v4873_v32, 128  ;;  %v1745_v40 = vmul.f32 %v5626_v41, %v6117_v44  ;;  %v5628_v32 = vpop.eup %5627  ;;  %v4887_v44 = vpack.i.bf16 %v1740_v21, %v1738_v46 }
 0x2e4   :  { %v1749_v63 = vmul.f32 %v5628_v32, %v6140_v31  ;;  %v5630_v51 = vpop.eup %5629 }
 0x2e5   :  { %v4777_v15 = vpack.i.bf16 %v1745_v40, %v1743_v58  ;;  %v1751_v24 = vmul.f32 %v5630_v51, %v6467_v45  ;;  %v1753_v62 = vmul.f32 %v5630_v51, %v6468_v16  ;;  %v5632_v26 = vpop.eup %5631  ;;  %v1750_v54 = vmul.f32 %v5630_v51, %v6473_v49  ;;  %v6484_v16 = vld [vmem:[#allocation41_spill] sm:$0xff] }
 0x2e6   :  { %v1755_v17 = vmul.f32 %v5632_v26, %v6471_v14  ;;  %v5634_v39 = vpop.eup %5633  ;;  %v1752_v59 = vmul.f32 %v5630_v51, %v6474_v6  ;;  %v6483_v51 = vld [vmem:[#allocation37_spill] sm:$0xff] }
 0x2e7   :  { %4876 = vxpose.xlu1.b32.cont [3/16] %v4875_v48, 128  ;;  %4768 = vxpose.xlu0.b32.cont [5/16] %v4767_v0, 128  ;;  %v1747_v48 = vmul.f32 %v5628_v32, %v6128_v10  ;;  %v6465_v0 = vld [vmem:[#allocation20_spill] sm:$0xff]  ;;  %v6469_v10 = vld [vmem:[#allocation22_spill] sm:$0xff]  ;;  %v4781_v34 = vpack.i.bf16 %v1753_v62, %v1751_v24  ;;  %v1759_v4 = vmul.f32 %v5634_v39, %v6475_v29 }
 0x2e8   :  { %v1742_v57 = vmul.f32 %v5626_v41, %v6465_v0  ;;  %v1746_v31 = vmul.f32 %v5628_v32, %v6469_v10  ;;  %v1761_v11 = vmul.f32 %v5634_v39, %v6197_v5  ;;  %v1756_v41 = vmul.f32 %v5632_v26, %v6477_v33 }
 0x2e9   :  { %v4779_v60 = vpack.i.bf16 %v1749_v63, %v1747_v48  ;;  %v4893_v30 = vpack.i.bf16 %v1752_v59, %v1750_v54  ;;  %v1758_v58 = vmul.f32 %v5634_v39, %v6478_v3  ;;  %v1760_v40 = vmul.f32 %v5634_v39, %v6185_v50  ;;  %v6482_v48 = vld [vmem:[#allocation36_spill] sm:$0xff] }
 0x2ea   :  { %v4889_v38 = vpack.i.bf16 %v1744_v12, %v1742_v57 }
 0x2eb   :  { %4878 = vxpose.xlu1.b32.cont [4/16] %v4877_v23, 128  ;;  %4770 = vxpose.xlu0.b32.cont [6/16] %v4769_v9, 128  ;;  %v6470_v23 = vld [vmem:[#allocation23_spill] sm:$0xff]  ;;  %v4897_v46 = vpack.i.bf16 %v1760_v40, %v1758_v58 }
 0x2ec   :  { %v1748_v9 = vmul.f32 %v5628_v32, %v6470_v23 }
 0x2ef   :  { %4880 = vxpose.xlu1.b32.cont [5/16] %v4879_v43, 128  ;;  %4772 = vxpose.xlu0.b32.cont [7/16] %v4771_v55, 128  ;;  %v6472_v43 = vld [vmem:[#allocation32_spill] sm:$0xff]  ;;  %v4891_v55 = vpack.i.bf16 %v1748_v9, %v1746_v31  ;;  %v6486_v31 = vld [vmem:[#allocation39_spill] sm:$0xff] }
 0x2f0   :  { %v1757_v13 = vmul.f32 %v5632_v26, %v6472_v43  ;;  %v6487_v9 = vld [vmem:[#allocation40_spill] sm:$0xff]  ;;  %v6489_v43 = vld [vmem:[#allocation42_spill] sm:$0xff] }
 0x2f2   :  { %v4783_v56 = vpack.i.bf16 %v1757_v13, %v1755_v17 }
 0x2f3   :  { %4882 = vxpose.xlu1.b32.cont [6/16] %v4881_v22, 128  ;;  %4774 = vxpose.xlu0.b32.cont [8/16] %v4773_v2, 128  ;;  %v5636_v22 = vpop.eup %5635  ;;  %v6476_v2 = vld [vmem:[#allocation28_spill] sm:$0xff] }
 0x2f4   :  { %v1754_v25 = vmul.f32 %v5632_v26, %v6476_v2  ;;  %v1763_v61 = vmul.f32 %v5636_v22, %v6210_v8  ;;  %v1765_v19 = vmul.f32 %v5636_v22, %v6222_v37  ;;  %v6480_v8 = vld [vmem:[#allocation34_spill] sm:$0xff]  ;;  %v6481_v37 = vld [vmem:[#allocation35_spill] sm:$0xff] }
 0x2f5   :  { %v1762_v36 = vmul.f32 %v5636_v22, %v6480_v8  ;;  %v6485_v26 = vld [vmem:[#allocation43_spill] sm:$0xff] }
 0x2f6   :  { %v4895_v52 = vpack.i.bf16 %v1756_v41, %v1754_v25  ;;  %v4787_v5 = vpack.i.bf16 %v1765_v19, %v1763_v61 }
 0x2f7   :  { %4884 = vxpose.xlu1.b32.cont [7/16] %v4883_v28, 128  ;;  %4776 = vxpose.xlu0.b32.cont [9/16] %v4775_v1, 128  ;;  %v4785_v28 = vpack.i.bf16 %v1761_v11, %v1759_v4  ;;  %v5638_v1 = vpop.eup %5637 }
 0x2f8   :  { %v1767_v32 = vmul.f32 %v5638_v1, %v6228_v35  ;;  %v1769_v53 = vmul.f32 %v5638_v1, %v6479_v27  ;;  %v1766_v63 = vmul.f32 %v5638_v1, %v6482_v48  ;;  %v1768_v47 = vmul.f32 %v5638_v1, %v6483_v51 }
 0x2fa   :  { %v4789_v21 = vpack.i.bf16 %v1769_v53, %v1767_v32  ;;  %v4901_v50 = vpack.i.bf16 %v1768_v47, %v1766_v63 }
 0x2fb   :  { %4886 = vxpose.xlu1.b32.cont [8/16] %v4885_v42, 128  ;;  %4778 = vxpose.xlu0.b32.cont [10/16] %v4777_v15, 128  ;;  %v1764_v42 = vmul.f32 %v5636_v22, %v6481_v37 }
 0x2fd   :  { %v4899_v15 = vpack.i.bf16 %v1764_v42, %v1762_v36 }
 0x2ff   :  { %4888 = vxpose.xlu1.b32.cont [9/16] %v4887_v44, 128  ;;  %4780 = vxpose.xlu0.b32.cont [11/16] %v4779_v60, 128  ;;  %v3978_v60 = vstv %s6399_s6  ;;  %s5769_s6 = smov [#allocation13]  }
 0x300   :  { %s4114_s29 = sshll.u32 %s5769_s6, 4  ;;  %s4115_s29 = int_to_ptr.vmem [resolvable:$true] %s4114_s29 }
 0x301   :  { %s5731_s30 = scalar_lea.vmem %s4115_s29, 256  ;;  %p5736_p5 = scmp.lt.s32.totalorder %s4115_s29, %s4115_s29 }
 0x302   :  { %p5732_p4 = scmp.ne.s32.totalorder %s4115_s29, %s5731_s30  ;;  %p5737_p6 = scmp.lt.s32.totalorder %s5731_s30, %s5731_s30 }
 0x303   :  { %4890 = vxpose.xlu1.b32.cont [10/16] %v4889_v38, 128  ;;  %4782 = vxpose.xlu0.b32.cont [12/16] %v4781_v34, 128  ;;  %v6488_v34 = vld [vmem:[#allocation44_spill] sm:$0xff] }
 0x304   :  { %p5738_p7 = por %p5737_p6, %p5736_p5 }
 0x306   :  { %p5739_p8 = pnand %p5738_p7, %p5732_p4 }
 0x307   :  { %4892 = vxpose.xlu1.b32.cont [11/16] %v4891_v55, 128  ;;  %4784 = vxpose.xlu0.b32.cont [13/16] %v4783_v56, 128 }
 0x30b   :  { %4894 = vxpose.xlu1.b32.cont [12/16] %v4893_v30, 128  ;;  %4786 = vxpose.xlu0.b32.cont [14/16] %v4785_v28, 128 }
 0x30f   :  { %4896 = vxpose.xlu1.b32.cont [13/16] %v4895_v52, 128  ;;  %4788 = vxpose.xlu0.b32.cont [15/16] %v4787_v5, 128 }
 0x313   :  { %4898 = vxpose.xlu1.b32.cont [14/16] %v4897_v46, 128  ;;  %4790 = vxpose.xlu0.b32.end [16/16] %v4789_v21, 128 }
 0x317   :  { %4900 = vxpose.xlu1.b32.cont [15/16] %v4899_v15, 128 }
 0x31b   :  { %4902 = vxpose.xlu1.b32.end [16/16] %v4901_v50, 128 }
 0x337   :  { %v3967_v35 = vpop.xlane.xlu0 %3966 }
 0x338   :  { %v3974_v44 = vadd.f32 1e-12, %v3967_v35 }
 0x339   :  { %v3972_v0 = vpop.xlane.xlu1 %3971 }
 0x33a   :  { %5639 = vrsqrt.f32 %v3974_v44  ;;  %v3975_v57 = vadd.f32 1e-12, %v3972_v0 }
 0x33c   :  { %5641 = vrsqrt.f32 %v3975_v57 }
 0x344   :  { %v5640_v20 = vpop.eup %5639 }
 0x345   :  { %v3979_v12 = vmul.f32 %v5640_v20, %v3978_v60 }
 0x346   :  { %v5642_v45 = vpop.eup %5641 }
 0x347   :  { %v3980_v24 = vmul.f32 %v5642_v45, %v3978_v60  ;;  %v3982_v62 = vmul.f32 %v3979_v12, %v6484_v16  ;;  %v3984_v10 = vmul.f32 %v3979_v12, %v6485_v26  ;;  %v6358_v23 = vmul.f32 %v3979_v12, %v6486_v31 }
 0x348   :  { %v6361_v38 = vmul.f32 %v3979_v12, %v6487_v9 }
 0x349   :  { %v3986_v14 = vmul.f32 %v3980_v24, %v6488_v34  ;;  %v3988_v17 = vmul.f32 %v3980_v24, %v6280_v7  ;;  %v6366_v13 = vmul.f32 %v3980_v24, %v6489_v43  ;;  %v6369_v39 = vmul.f32 %v3980_v24, %v6270_v18 }
 0x34b   :  { %v3990_v55 = vpack.c.bf16 %v3986_v14, %v3982_v62  ;;  %v3992_v49 = vpack.c.bf16 %v3988_v17, %v3984_v10  ;;  %v3989_v54 = vpack.c.bf16 %v6366_v13, %v6358_v23  ;;  %v3991_v56 = vpack.c.bf16 %v6369_v39, %v6361_v38 }
 0x34d   :  { %4057 = vmatprep.mubr.bf16.mxu0 %v3990_v55  ;;  %4098 = vmatprep.mubr.bf16.mxu1 %v3992_v49 }
 0x357   :  { %v4791_v6 = vpop.trf.xlu0 }
 0x358   :  { %v4795_v59 = vunpack.i.h.bf16 %v4791_v6  ;;  %v4792_v29 = vunpack.i.l.bf16 %v4791_v6 }
 0x35b   :  { %v4796_v7 = vpop.trf.xlu0 }
 0x35c   :  { %v4800_v4 = vunpack.i.h.bf16 %v4796_v7  ;;  %v4797_v11 = vunpack.i.l.bf16 %v4796_v7 }
 0x35e   :  { %v1906_v22 = vpack.c.bf16 %v4797_v11, %v4792_v29  ;;  %v1922_v2 = vpack.c.bf16 %v4800_v4, %v4795_v59 }
 0x35f   :  { %v4903_v18 = vpop.trf.xlu1  ;;  %v4801_v25 = vpop.trf.xlu0 }
 0x360   :  { %4552 = vmatprep.subr.bf16.mxu0 %v1906_v22  ;;  %4574 = vmatprep.subr.bf16.mxu1 %v1922_v2  ;;  %v4907_v33 = vunpack.i.h.bf16 %v4903_v18  ;;  %v4904_v41 = vunpack.i.l.bf16 %v4903_v18  ;;  %v4805_v30 = vunpack.i.h.bf16 %v4801_v25  ;;  %v4802_v28 = vunpack.i.l.bf16 %v4801_v25 }
 0x363   :  { %v4908_v61 = vpop.trf.xlu1  ;;  %v4806_v19 = vpop.trf.xlu0 }
 0x364   :  { %v4912_v1 = vunpack.i.h.bf16 %v4908_v61  ;;  %v4909_v52 = vunpack.i.l.bf16 %v4908_v61  ;;  %v4810_v3 = vunpack.i.h.bf16 %v4806_v19  ;;  %v4807_v58 = vunpack.i.l.bf16 %v4806_v19 }
 0x366   :  { %v1898_v5 = vpack.c.bf16 %v4909_v52, %v4904_v41  ;;  %v1914_v40 = vpack.c.bf16 %v4912_v1, %v4907_v33  ;;  %v1907_v53 = vpack.c.bf16 %v4807_v58, %v4802_v28  ;;  %v1923_v46 = vpack.c.bf16 %v4810_v3, %v4805_v30 }
 0x367   :  { %v4913_v32 = vpop.trf.xlu1  ;;  %v4811_v27 = vpop.trf.xlu0 }
 0x368   :  { %4553 = vmatpush3.bf16.msra.mxu0 %v1898_v5  ;;  %4575 = vmatpush3.bf16.msra.mxu1 %v1914_v40  ;;  %v4917_v21 = vunpack.i.h.bf16 %v4913_v32  ;;  %v4914_v8 = vunpack.i.l.bf16 %v4913_v32  ;;  %v4815_v36 = vunpack.i.h.bf16 %v4811_v27  ;;  %v4812_v37 = vunpack.i.l.bf16 %v4811_v27 }
 0x369   :  { %4554 = vmatprep.subr.bf16.mxu0 %v1907_v53  ;;  %4576 = vmatprep.subr.bf16.mxu1 %v1923_v46 }
 0x36b   :  { %v4918_v42 = vpop.trf.xlu1  ;;  %v4816_v15 = vpop.trf.xlu0 }
 0x36c   :  { %v4922_v48 = vunpack.i.h.bf16 %v4918_v42  ;;  %v4919_v63 = vunpack.i.l.bf16 %v4918_v42  ;;  %v4820_v51 = vunpack.i.h.bf16 %v4816_v15  ;;  %v4817_v47 = vunpack.i.l.bf16 %v4816_v15 }
 0x36e   :  { %v1899_v50 = vpack.c.bf16 %v4919_v63, %v4914_v8  ;;  %v1915_v35 = vpack.c.bf16 %v4922_v48, %v4917_v21  ;;  %v1908_v57 = vpack.c.bf16 %v4817_v47, %v4812_v37  ;;  %v1924_v60 = vpack.c.bf16 %v4820_v51, %v4815_v36 }
 0x36f   :  { %v4923_v44 = vpop.trf.xlu1  ;;  %v4821_v0 = vpop.trf.xlu0 }
 0x370   :  { %4555 = vmatpush3.bf16.msra.mxu0 %v1899_v50  ;;  %4577 = vmatpush3.bf16.msra.mxu1 %v1915_v35  ;;  %v4927_v20 = vunpack.i.h.bf16 %v4923_v44  ;;  %v4924_v12 = vunpack.i.l.bf16 %v4923_v44  ;;  %v4825_v45 = vunpack.i.h.bf16 %v4821_v0  ;;  %v4822_v24 = vunpack.i.l.bf16 %v4821_v0 }
 0x371   :  { %4556 = vmatprep.subr.bf16.mxu0 %v1908_v57  ;;  %4578 = vmatprep.subr.bf16.mxu1 %v1924_v60 }
 0x373   :  { %v4928_v16 = vpop.trf.xlu1  ;;  %v4826_v62 = vpop.trf.xlu0 }
 0x374   :  { %v4932_v26 = vunpack.i.h.bf16 %v4928_v16  ;;  %v4929_v10 = vunpack.i.l.bf16 %v4928_v16  ;;  %v4830_v31 = vunpack.i.h.bf16 %v4826_v62  ;;  %v4827_v9 = vunpack.i.l.bf16 %v4826_v62 }
 0x376   :  { %v1900_v34 = vpack.c.bf16 %v4929_v10, %v4924_v12  ;;  %v1916_v14 = vpack.c.bf16 %v4932_v26, %v4927_v20  ;;  %v1909_v55 = vpack.c.bf16 %v4827_v9, %v4822_v24  ;;  %v1925_v49 = vpack.c.bf16 %v4830_v31, %v4825_v45 }
 0x377   :  { %v4933_v17 = vpop.trf.xlu1  ;;  %v4831_v43 = vpop.trf.xlu0 }
 0x378   :  { %4557 = vmatpush3.bf16.msra.mxu0 %v1900_v34  ;;  %4579 = vmatpush3.bf16.msra.mxu1 %v1916_v14  ;;  %v4937_v6 = vunpack.i.h.bf16 %v4933_v17  ;;  %v4934_v59 = vunpack.i.l.bf16 %v4933_v17  ;;  %v4835_v29 = vunpack.i.h.bf16 %v4831_v43  ;;  %v4832_v7 = vunpack.i.l.bf16 %v4831_v43 }
 0x379   :  { %4558 = vmatprep.subr.bf16.mxu0 %v1909_v55  ;;  %4580 = vmatprep.subr.bf16.mxu1 %v1925_v49 }
 0x37b   :  { %v4938_v4 = vpop.trf.xlu1  ;;  %v4836_v11 = vpop.trf.xlu0 }
 0x37c   :  { %v4942_v22 = vunpack.i.h.bf16 %v4938_v4  ;;  %v4939_v2 = vunpack.i.l.bf16 %v4938_v4  ;;  %v4840_v18 = vunpack.i.h.bf16 %v4836_v11  ;;  %v4837_v25 = vunpack.i.l.bf16 %v4836_v11 }
 0x37e   :  { %v1901_v33 = vpack.c.bf16 %v4939_v2, %v4934_v59  ;;  %v1917_v41 = vpack.c.bf16 %v4942_v22, %v4937_v6  ;;  %v1910_v61 = vpack.c.bf16 %v4837_v25, %v4832_v7  ;;  %v1926_v19 = vpack.c.bf16 %v4840_v18, %v4835_v29 }
 0x37f   :  { %v4943_v30 = vpop.trf.xlu1  ;;  %v4841_v28 = vpop.trf.xlu0 }
 0x380   :  { %4559 = vmatpush3.bf16.msra.mxu0 %v1901_v33  ;;  %4581 = vmatpush3.bf16.msra.mxu1 %v1917_v41  ;;  %v4947_v1 = vunpack.i.h.bf16 %v4943_v30  ;;  %v4944_v52 = vunpack.i.l.bf16 %v4943_v30  ;;  %v4845_v3 = vunpack.i.h.bf16 %v4841_v28  ;;  %v4842_v58 = vunpack.i.l.bf16 %v4841_v28 }
 0x381   :  { %4560 = vmatprep.subr.bf16.mxu0 %v1910_v61  ;;  %4582 = vmatprep.subr.bf16.mxu1 %v1926_v19 }
 0x383   :  { %v4948_v5 = vpop.trf.xlu1  ;;  %v4846_v40 = vpop.trf.xlu0 }
 0x384   :  { %v4952_v32 = vunpack.i.h.bf16 %v4948_v5  ;;  %v4949_v27 = vunpack.i.l.bf16 %v4948_v5  ;;  %v4850_v53 = vunpack.i.h.bf16 %v4846_v40  ;;  %v4847_v46 = vunpack.i.l.bf16 %v4846_v40 }
 0x386   :  { %v1902_v21 = vpack.c.bf16 %v4949_v27, %v4944_v52  ;;  %v1918_v8 = vpack.c.bf16 %v4952_v32, %v4947_v1  ;;  %v1911_v42 = vpack.c.bf16 %v4847_v46, %v4842_v58  ;;  %v1927_v15 = vpack.c.bf16 %v4850_v53, %v4845_v3 }
 0x387   :  { %v4953_v36 = vpop.trf.xlu1  ;;  %v4851_v37 = vpop.trf.xlu0 }
 0x388   :  { %4561 = vmatpush3.bf16.msra.mxu0 %v1902_v21  ;;  %4583 = vmatpush3.bf16.msra.mxu1 %v1918_v8  ;;  %v4957_v48 = vunpack.i.h.bf16 %v4953_v36  ;;  %v4954_v63 = vunpack.i.l.bf16 %v4953_v36  ;;  %v4855_v51 = vunpack.i.h.bf16 %v4851_v37  ;;  %v4852_v47 = vunpack.i.l.bf16 %v4851_v37 }
 0x389   :  { %4562 = vmatprep.subr.bf16.mxu0 %v1911_v42  ;;  %4584 = vmatprep.subr.bf16.mxu1 %v1927_v15 }
 0x38b   :  { %v4958_v50 = vpop.trf.xlu1  ;;  %v4856_v35 = vpop.trf.xlu0 }
 0x38c   :  { %v4962_v44 = vunpack.i.h.bf16 %v4958_v50  ;;  %v4959_v0 = vunpack.i.l.bf16 %v4958_v50  ;;  %v4860_v57 = vunpack.i.h.bf16 %v4856_v35  ;;  %v4857_v60 = vunpack.i.l.bf16 %v4856_v35 }
 0x38e   :  { %v1903_v20 = vpack.c.bf16 %v4959_v0, %v4954_v63  ;;  %v1919_v12 = vpack.c.bf16 %v4962_v44, %v4957_v48  ;;  %v1912_v16 = vpack.c.bf16 %v4857_v60, %v4852_v47  ;;  %v1928_v62 = vpack.c.bf16 %v4860_v57, %v4855_v51 }
 0x38f   :  { %v4963_v45 = vpop.trf.xlu1  ;;  %v4861_v24 = vpop.trf.xlu0 }
 0x390   :  { %4563 = vmatpush3.bf16.msra.mxu0 %v1903_v20  ;;  %4585 = vmatpush3.bf16.msra.mxu1 %v1919_v12  ;;  %v4967_v26 = vunpack.i.h.bf16 %v4963_v45  ;;  %v4964_v10 = vunpack.i.l.bf16 %v4963_v45  ;;  %v4865_v31 = vunpack.i.h.bf16 %v4861_v24  ;;  %v4862_v9 = vunpack.i.l.bf16 %v4861_v24 }
 0x391   :  { %4564 = vmatprep.subr.bf16.mxu0 %v1912_v16  ;;  %4586 = vmatprep.subr.bf16.mxu1 %v1928_v62 }
 0x393   :  { %v4968_v34 = vpop.trf.xlu1  ;;  %v4866_v14 = vpop.trf.xlu0 }
 0x394   :  { %v4972_v17 = vunpack.i.h.bf16 %v4968_v34  ;;  %v4969_v43 = vunpack.i.l.bf16 %v4968_v34  ;;  %v4870_v55 = vunpack.i.h.bf16 %v4866_v14  ;;  %v4867_v49 = vunpack.i.l.bf16 %v4866_v14 }
 0x396   :  { %v1904_v6 = vpack.c.bf16 %v4969_v43, %v4964_v10  ;;  %v1920_v59 = vpack.c.bf16 %v4972_v17, %v4967_v26  ;;  %v1913_v7 = vpack.c.bf16 %v4867_v49, %v4862_v9  ;;  %v1929_v4 = vpack.c.bf16 %v4870_v55, %v4865_v31 }
 0x397   :  { %v4973_v29 = vpop.trf.xlu1 }
 0x398   :  { %4565 = vmatpush3.bf16.msra.mxu0 %v1904_v6  ;;  %4587 = vmatpush3.bf16.msra.mxu1 %v1920_v59  ;;  %v4977_v11 = vunpack.i.h.bf16 %v4973_v29  ;;  %v4974_v22 = vunpack.i.l.bf16 %v4973_v29 }
 0x399   :  { %4566 = vmatprep.subr.bf16.mxu0 %v1913_v7  ;;  %4588 = vmatprep.subr.bf16.mxu1 %v1929_v4 }
 0x39b   :  { %v4978_v2 = vpop.trf.xlu1 }
 0x39c   :  { %v4982_v18 = vunpack.i.h.bf16 %v4978_v2  ;;  %v4979_v25 = vunpack.i.l.bf16 %v4978_v2 }
 0x39e   :  { %v1905_v33 = vpack.c.bf16 %v4979_v25, %v4974_v22  ;;  %v1921_v41 = vpack.c.bf16 %v4982_v18, %v4977_v11 }
 0x3a0   :  { %4567 = vmatpush3.bf16.msra.mxu0 %v1905_v33  ;;  %4589 = vmatpush3.bf16.msra.mxu1 %v1921_v41 }
 0x3a3   :  { %4058 = vmatmul.mubr.bf16.vlgmr.msra.gmra.mrb[36].mxu0 %v3989_v54  ;;  %4099 = vmatmul.mubr.bf16.vlgmr.msra.gmra.mrb[36].mxu1 %v3991_v56 }
 0x476   :  { %v4568_v30 = vpop.f32.mrb[36].mxu0  ;;  %v4590_v28 = vpop.f32.mrb[36].mxu1 }
 0x477   :  { %v4569_v61 = vpop.f32.mrb[37].mxu0  ;;  %v4591_v19 = vpop.f32.mrb[37].mxu1 }
 0x478   :  { %v4570_v1 = vadd.f32 %v4569_v61, %v4568_v30  ;;  %v4592_v52 = vadd.f32 %v4591_v19, %v4590_v28  ;;  %v4571_v3 = vpop.f32.mrb[38].mxu0  ;;  %v4593_v58 = vpop.f32.mrb[38].mxu1 }
 0x479   :  { %v4572_v5 = vpop.f32.mrb[39].mxu0  ;;  %v4594_v40 = vpop.f32.mrb[39].mxu1 }
 0x47a   :  { %v4101_v32 = vadd.f32 %v4592_v52, %v4570_v1  ;;  %v4573_v27 = vadd.f32 %v4572_v5, %v4571_v3  ;;  %v4595_v23 = vadd.f32 %v4594_v40, %v4593_v58 }
 0x47c   :  { %4107 = vst [vmem:[#allocation13] sm:$0xff] %v4101_v32  ;;  %v4104_v13 = vadd.f32 %v4595_v23, %v4573_v27 }
 0x47e   :  { %4108 = vst [vmem:[#allocation13 + $0x8] sm:$0xff] %v4104_v13 }
 0x47f   :  { %5742 = shalt.err (!%p5739_p8)
}
 0x480   :  { %s5743_s10 = scalar_lea.hbm %s6400_s7, 256 }
 0x481   :  { %p5744_p9 = scmp.ne.s32.totalorder %s6400_s7, %s5743_s10  ;;  %p5747_p10 = scmp.lt.u32.totalorder %s5743_s10, %s6400_s7 }
 0x483   :  { %p5749_p11 = pnand %p5747_p10, %p5744_p9 }
 0x485   :  { %5752 = shalt.err (!%p5749_p11)
}
 0x486   :  { %s5770_s18 = smov 128   ;;  %s5771_s0 = smov 8  }
 0x487   :  { %4120 = dma.vmem_to_hbm [thread:$0]  %s4115_s29, 256, %s6400_s7, [#allocation7], %s5770_s18, %s5770_s18, %s5771_s0  }
 0x488   :  { %5759 = dma.done.wait [#allocation7], 256  }
 0x489   :  { %5760 = vsyncadd [#allocation7], 4294967040 }
 0x48a   :  { %4124 = vsyncpa [#allocation6], 1 }
 0x48b   :  { %4125 = vsyncpa [#allocation9], 1 }
 0x48c   :  { %4126 = vsyncpa [#allocation12], 1 }
 0x48d   :  { %4127 = vsyncpa [#allocation7], 1 }

</bundles_post_ra>
